<compile_context>
chip_gen: v7x
topology: tpu7x:2x2x1
jax: 0.10.0
libtpu: 0.0.40
codegen_flags: <defaults>
</compile_context>

<pallas_src>
import math
import functools

import jax
import jax.numpy as jnp
from jax.experimental import pallas as pl
from jax.experimental.pallas import tpu as pltpu


def _mha_kernel(q_ref, k_ref, v_ref, mask_ref,
                wqt_ref, bq_ref, wkt_ref, bk_ref,
                wvt_ref, bv_ref, wot_ref, bo_ref,
                o_ref, kh_scr, vh_scr, *, num_heads: int, head_dim: int):
    H, D = num_heads, head_dim
    tq = q_ref.shape[1]          # query-tile length
    S = k_ref.shape[1]           # full key/value length
    E = q_ref.shape[2]

    # ---- K/V heads: built once per batch, reused by every query tile. ----
    @pl.when(pl.program_id(1) == 0)
    def _build_kv():
        k_in = k_ref[0].astype(jnp.bfloat16)                         # (S, E)
        v_in = v_ref[0].astype(jnp.bfloat16)
        kp = jnp.dot(k_in, wkt_ref[...],
                     preferred_element_type=jnp.float32) + bk_ref[...]
        vp = jnp.dot(v_in, wvt_ref[...],
                     preferred_element_type=jnp.float32) + bv_ref[...]
        kh_scr[...] = jnp.transpose(kp.reshape(S, H, D),
                                    (1, 0, 2)).astype(jnp.bfloat16)  # (H, S, D)
        vh_scr[...] = jnp.transpose(vp.reshape(S, H, D),
                                    (1, 0, 2)).astype(jnp.bfloat16)  # (H, S, D)

    # ---- Q projection for this query tile (scale folded into Wq/bq). ----
    q_in = q_ref[0].astype(jnp.bfloat16)                             # (tq, E)
    qp = jnp.dot(q_in, wqt_ref[...],
                 preferred_element_type=jnp.float32) + bq_ref[...]
    qh = jnp.transpose(qp.reshape(tq, H, D),
                       (1, 0, 2)).astype(jnp.bfloat16)               # (H, tq, D)

    # ---- Additive mask bias (int8 mask, 0 = masked out), once per step. ----
    mask = mask_ref[0, 0].astype(jnp.int32)                          # (tq, S)
    bias = jnp.where(mask == 0, jnp.float32(-1e9), jnp.float32(0.0))
    # NOTE: additive -1e9 bias matches masked_fill_(-1e9) to fp precision for
    # any row with at least one unmasked key (fully-masked rows are degenerate
    # in the original module as well).

    # ---- Scores (bf16 MXU, f32 accumulation), batched over heads. ----
    s = jnp.einsum('hqd,hkd->hqk', qh, kh_scr[...],
                   preferred_element_type=jnp.float32)               # (H, tq, S)
    s = s + bias[None, :, :]

    # Numerically-stable softmax in f32; the row-sum division is folded into
    # the much smaller P@V result via the EUP approximate reciprocal.
    s_max = jnp.max(s, axis=-1, keepdims=True)                       # (H, tq, 1)
    p = jnp.exp(s - s_max)                                           # (H, tq, S)
    l = jnp.sum(p, axis=-1, keepdims=True)                           # (H, tq, 1)

    ctx = jnp.einsum('hqk,hkd->hqd', p.astype(jnp.bfloat16), vh_scr[...],
                     preferred_element_type=jnp.float32)             # (H, tq, D)
    ctx = ctx * pl.reciprocal(l, approx=True)                        # EUP vrcp

    # ---- Merge heads (single transpose+reshape) + output projection. ----
    ctx = jnp.transpose(ctx, (1, 0, 2)).reshape(tq, E).astype(jnp.bfloat16)
    out = jnp.dot(ctx, wot_ref[...],
                  preferred_element_type=jnp.float32) + bo_ref[...]
    o_ref[0] = out.astype(o_ref.dtype)


def multi_head_attention(q, k, v, mask, params, *, num_heads: int,
                         q_tile: int | None = None):
    """q, k, v: (B, S, E); mask: (B, 1, S, S) with 0 = masked-out."""
    B, S, E = q.shape
    assert E % num_heads == 0
    D = E // num_heads

    tq = q_tile if q_tile is not None else (S if S <= 128 else 128)
    assert S % tq == 0
    n_q = S // tq

    kernel = functools.partial(_mha_kernel, num_heads=num_heads, head_dim=D)

    # Host-side one-time prep: pre-transposed bf16 weights (kernel runs plain
    # x @ Wt on the MXU), 1/sqrt(D) folded into the Q projection, biases kept
    # f32 (added after f32 accumulation), int8 mask (4x less HBM->VMEM DMA).
    scale = 1.0 / math.sqrt(D)
    wqt = (params["wq"].T * scale).astype(jnp.bfloat16)
    bq = (params["bq"] * scale).astype(jnp.float32)
    wkt = params["wk"].T.astype(jnp.bfloat16)
    wvt = params["wv"].T.astype(jnp.bfloat16)
    wot = params["wo"].T.astype(jnp.bfloat16)
    mask_i8 = (mask != 0).astype(jnp.int8)

    q_spec = pl.BlockSpec((1, tq, E), lambda b, i: (b, i, 0))
    kv_spec = pl.BlockSpec((1, S, E), lambda b, i: (b, 0, 0))
    mask_spec = pl.BlockSpec((1, 1, tq, S), lambda b, i: (b, 0, i, 0))
    w_spec = pl.BlockSpec((E, E), lambda b, i: (0, 0))
    b_spec = pl.BlockSpec((1, E), lambda b, i: (0, 0))

    return pl.pallas_call(
        kernel,
        out_shape=jax.ShapeDtypeStruct((B, S, E), q.dtype),
        grid_spec=pltpu.PrefetchScalarGridSpec(
            num_scalar_prefetch=0,
            grid=(B, n_q),
            in_specs=[q_spec, kv_spec, kv_spec, mask_spec,
                      w_spec, b_spec, w_spec, b_spec,
                      w_spec, b_spec, w_spec, b_spec],
            out_specs=q_spec,
            scratch_shapes=[pltpu.VMEM((num_heads, S, D), jnp.bfloat16),
                            pltpu.VMEM((num_heads, S, D), jnp.bfloat16)]),
        compiler_params=pltpu.CompilerParams(
            dimension_semantics=("parallel", "arbitrary")),
    )(q, k, v, mask_i8,
      wqt, bq, wkt, params["bk"],
      wvt, params["bv"], wot, params["bo"])


def _reference(q, k, v, mask, params, num_heads):
    """Pure-JAX f32 replica of the PyTorch forward (dropout = eval/identity)."""
    B, S, E = q.shape
    D = E // num_heads

    def lin(x, w, b):
        return x @ w.T + b

    qp = lin(q, params["wq"], params["bq"])
    kp = lin(k, params["wk"], params["bk"])
    vp = lin(v, params["wv"], params["bv"])

    def split(x):  # (B,S,E) -> (B,H,S,D)
        return x.reshape(B, S, num_heads, D).transpose(0, 2, 1, 3)

    qh, kh, vh = split(qp), split(kp), split(vp)
    scores = jnp.einsum("bhqd,bhkd->bhqk", qh, kh) / math.sqrt(D)
    scores = jnp.where(mask == 0, -1e9, scores)
    probs = jax.nn.softmax(scores, axis=-1)
    ctx = jnp.einsum("bhqk,bhkd->bhqd", probs, vh)
    ctx = ctx.transpose(0, 2, 1, 3).reshape(B, S, E)
    return lin(ctx, params["wo"], params["bo"])


if __name__ == "__main__":
    B, S, E, H = 2, 16, 32, 4

    key = jax.random.PRNGKey(0)
    keys = jax.random.split(key, 12)

    def init_linear(kw, kb, fan_in):
        bound = 1.0 / math.sqrt(fan_in)
        w = jax.random.uniform(kw, (E, E), jnp.float32, -bound, bound)
        b = jax.random.uniform(kb, (1, E), jnp.float32, -bound, bound)
        return w, b

    wq, bq = init_linear(keys[0], keys[1], E)
    wk, bk = init_linear(keys[2], keys[3], E)
    wv, bv = init_linear(keys[4], keys[5], E)
    wo, bo = init_linear(keys[6], keys[7], E)
    params = dict(wq=wq, bq=bq, wk=wk, bk=bk, wv=wv, bv=bv, wo=wo, bo=bo)

    q = jax.random.normal(keys[8], (B, S, E), jnp.float32)
    k = jax.random.normal(keys[9], (B, S, E), jnp.float32)
    v = jax.random.normal(keys[10], (B, S, E), jnp.float32)
    # causal-style mask (B, 1, S, S), 0 = masked-out
    mask = jnp.tril(jnp.ones((S, S), jnp.int32))[None, None].repeat(B, axis=0)

    # q_tile=8 -> 2 query tiles per batch, exercising the per-batch K/V cache.
    out = multi_head_attention(q, k, v, mask, params, num_heads=H, q_tile=8)
    out = jax.block_until_ready(out)

    ref = _reference(q, k, v, mask, params, H)
    assert out.shape == (B, S, E)
    # Tolerance accounts for bf16 matmul operands (f32 accumulation) and the
    # EUP approximate reciprocal vs. the all-f32 reference.
    assert jnp.allclose(out, ref, atol=5e-2, rtol=5e-2), "mismatch vs reference"

    print("KERNEL_OK")
</pallas_src>

<mosaic_0001>
module attributes {stable_mosaic.version = 11 : i64} {
  func.func @_mha_kernel(%arg0: i32, %arg1: i32, %arg2: memref<1x8x32xf32, #tpu.memory_space<vmem>>, %arg3: memref<1x16x32xf32, #tpu.memory_space<vmem>>, %arg4: memref<1x16x32xf32, #tpu.memory_space<vmem>>, %arg5: memref<1x1x8x16xi8, #tpu.memory_space<vmem>>, %arg6: memref<32x32xbf16, #tpu.memory_space<vmem>>, %arg7: memref<1x32xf32, #tpu.memory_space<vmem>>, %arg8: memref<32x32xbf16, #tpu.memory_space<vmem>>, %arg9: memref<1x32xf32, #tpu.memory_space<vmem>>, %arg10: memref<32x32xbf16, #tpu.memory_space<vmem>>, %arg11: memref<1x32xf32, #tpu.memory_space<vmem>>, %arg12: memref<32x32xbf16, #tpu.memory_space<vmem>>, %arg13: memref<1x32xf32, #tpu.memory_space<vmem>>, %arg14: memref<1x8x32xf32, #tpu.memory_space<vmem>>, %arg15: memref<4x16x8xbf16, #tpu.memory_space<vmem>>, %arg16: memref<4x16x8xbf16, #tpu.memory_space<vmem>>) attributes {dimension_semantics = [#tpu.dimension_semantics<parallel>, #tpu.dimension_semantics<arbitrary>], iteration_bounds = array<i64: 2, 2>, scalar_prefetch = 0 : i64, scratch_operands = 2 : i64, tpu.core_type = #tpu.core_type<tc>, window_params = [{transform_indices = @transform_0, window_bounds = array<i64: 1, 8, 32>}, {transform_indices = @transform_1, window_bounds = array<i64: 1, 16, 32>}, {transform_indices = @transform_2, window_bounds = array<i64: 1, 16, 32>}, {transform_indices = @transform_3, window_bounds = array<i64: 1, 1, 8, 16>}, {pipeline_mode = #tpu.pipeline_mode<synchronous>, transform_indices = @transform_4, window_bounds = array<i64: 32, 32>}, {pipeline_mode = #tpu.pipeline_mode<synchronous>, transform_indices = @transform_5, window_bounds = array<i64: 1, 32>}, {pipeline_mode = #tpu.pipeline_mode<synchronous>, transform_indices = @transform_6, window_bounds = array<i64: 32, 32>}, {pipeline_mode = #tpu.pipeline_mode<synchronous>, transform_indices = @transform_7, window_bounds = array<i64: 1, 32>}, {pipeline_mode = #tpu.pipeline_mode<synchronous>, transform_indices = @transform_8, window_bounds = array<i64: 32, 32>}, {pipeline_mode = #tpu.pipeline_mode<synchronous>, transform_indices = @transform_9, window_bounds = array<i64: 1, 32>}, {pipeline_mode = #tpu.pipeline_mode<synchronous>, transform_indices = @transform_10, window_bounds = array<i64: 32, 32>}, {pipeline_mode = #tpu.pipeline_mode<synchronous>, transform_indices = @transform_11, window_bounds = array<i64: 1, 32>}, {transform_indices = @transform_12, window_bounds = array<i64: 1, 8, 32>}]} {
    %c0_i32 = arith.constant 0 : i32
    %0 = arith.cmpi eq, %arg1, %c0_i32 : i32
    %1 = arith.extui %0 : i1 to i32
    %c0_i32_0 = arith.constant 0 : i32
    %2 = arith.cmpi ne, %1, %c0_i32_0 : i32
    scf.if %2 {
      %c0_32 = arith.constant 0 : index
      %c0_33 = arith.constant 0 : index
      %c0_34 = arith.constant 0 : index
      %51 = vector.load %arg3[%c0_32, %c0_33, %c0_34] : memref<1x16x32xf32, #tpu.memory_space<vmem>>, vector<1x16x32xf32>
      %52 = vector.shape_cast %51 : vector<1x16x32xf32> to vector<16x32xf32>
      %53 = arith.truncf %52 : vector<16x32xf32> to vector<16x32xbf16>
      %c0_35 = arith.constant 0 : index
      %c0_36 = arith.constant 0 : index
      %c0_37 = arith.constant 0 : index
      %54 = vector.load %arg4[%c0_35, %c0_36, %c0_37] : memref<1x16x32xf32, #tpu.memory_space<vmem>>, vector<1x16x32xf32>
      %55 = vector.shape_cast %54 : vector<1x16x32xf32> to vector<16x32xf32>
      %56 = arith.truncf %55 : vector<16x32xf32> to vector<16x32xbf16>
      %c0_38 = arith.constant 0 : index
      %c0_39 = arith.constant 0 : index
      %57 = vector.load %arg8[%c0_38, %c0_39] : memref<32x32xbf16, #tpu.memory_space<vmem>>, vector<32x32xbf16>
      %cst_40 = arith.constant dense<0.000000e+00> : vector<16x32xf32>
      %58 = tpu.matmul %53, %57, %cst_40 {dimension_numbers = #tpu.dot_dimension_numbers<[1], [0], [0], [1], [0, 0, 1, 1], [], []>} : vector<16x32xbf16>, vector<32x32xbf16>, vector<16x32xf32> -> vector<16x32xf32>
      %c0_41 = arith.constant 0 : index
      %c0_42 = arith.constant 0 : index
      %59 = vector.load %arg9[%c0_41, %c0_42] : memref<1x32xf32, #tpu.memory_space<vmem>>, vector<1x32xf32>
      %60 = vector.broadcast %59 : vector<1x32xf32> to vector<16x32xf32>
      %61 = arith.addf %58, %60 : vector<16x32xf32>
      %c0_43 = arith.constant 0 : index
      %c0_44 = arith.constant 0 : index
      %62 = vector.load %arg10[%c0_43, %c0_44] : memref<32x32xbf16, #tpu.memory_space<vmem>>, vector<32x32xbf16>
      %cst_45 = arith.constant dense<0.000000e+00> : vector<16x32xf32>
      %63 = tpu.matmul %56, %62, %cst_45 {dimension_numbers = #tpu.dot_dimension_numbers<[1], [0], [0], [1], [0, 0, 1, 1], [], []>} : vector<16x32xbf16>, vector<32x32xbf16>, vector<16x32xf32> -> vector<16x32xf32>
      %c0_46 = arith.constant 0 : index
      %c0_47 = arith.constant 0 : index
      %64 = vector.load %arg11[%c0_46, %c0_47] : memref<1x32xf32, #tpu.memory_space<vmem>>, vector<1x32xf32>
      %65 = vector.broadcast %64 : vector<1x32xf32> to vector<16x32xf32>
      %66 = arith.addf %63, %65 : vector<16x32xf32>
      %67 = vector.shape_cast %61 : vector<16x32xf32> to vector<16x4x8xf32>
      %68 = tpu.transpose %67, [1, 0, 2] : vector<16x4x8xf32> -> vector<4x16x8xf32>
      %69 = arith.truncf %68 : vector<4x16x8xf32> to vector<4x16x8xbf16>
      %c0_48 = arith.constant 0 : index
      %c0_49 = arith.constant 0 : index
      %c0_50 = arith.constant 0 : index
      %70 = vector.load %arg15[%c0_48, %c0_49, %c0_50] : memref<4x16x8xbf16, #tpu.memory_space<vmem>>, vector<4x16x8xbf16>
      tpu.vector_store %arg15[%c0_48, %c0_49, %c0_50], %69 {strides = array<i32>} : memref<4x16x8xbf16, #tpu.memory_space<vmem>>, vector<4x16x8xbf16>,
      %71 = vector.shape_cast %66 : vector<16x32xf32> to vector<16x4x8xf32>
      %72 = tpu.transpose %71, [1, 0, 2] : vector<16x4x8xf32> -> vector<4x16x8xf32>
      %73 = arith.truncf %72 : vector<4x16x8xf32> to vector<4x16x8xbf16>
      %c0_51 = arith.constant 0 : index
      %c0_52 = arith.constant 0 : index
      %c0_53 = arith.constant 0 : index
      %74 = vector.load %arg16[%c0_51, %c0_52, %c0_53] : memref<4x16x8xbf16, #tpu.memory_space<vmem>>, vector<4x16x8xbf16>
      tpu.vector_store %arg16[%c0_51, %c0_52, %c0_53], %73 {strides = array<i32>} : memref<4x16x8xbf16, #tpu.memory_space<vmem>>, vector<4x16x8xbf16>,
    } else {
    }
    %c0 = arith.constant 0 : index
    %c0_1 = arith.constant 0 : index
    %c0_2 = arith.constant 0 : index
    %3 = vector.load %arg2[%c0, %c0_1, %c0_2] : memref<1x8x32xf32, #tpu.memory_space<vmem>>, vector<1x8x32xf32>
    %4 = vector.shape_cast %3 : vector<1x8x32xf32> to vector<8x32xf32>
    %5 = arith.truncf %4 : vector<8x32xf32> to vector<8x32xbf16>
    %c0_3 = arith.constant 0 : index
    %c0_4 = arith.constant 0 : index
    %6 = vector.load %arg6[%c0_3, %c0_4] : memref<32x32xbf16, #tpu.memory_space<vmem>>, vector<32x32xbf16>
    %cst = arith.constant dense<0.000000e+00> : vector<8x32xf32>
    %7 = tpu.matmul %5, %6, %cst {dimension_numbers = #tpu.dot_dimension_numbers<[1], [0], [0], [1], [0, 0, 1, 1], [], []>} : vector<8x32xbf16>, vector<32x32xbf16>, vector<8x32xf32> -> vector<8x32xf32>
    %c0_5 = arith.constant 0 : index
    %c0_6 = arith.constant 0 : index
    %8 = vector.load %arg7[%c0_5, %c0_6] : memref<1x32xf32, #tpu.memory_space<vmem>>, vector<1x32xf32>
    %9 = vector.broadcast %8 : vector<1x32xf32> to vector<8x32xf32>
    %10 = arith.addf %7, %9 : vector<8x32xf32>
    %11 = vector.shape_cast %10 : vector<8x32xf32> to vector<8x4x8xf32>
    %12 = tpu.transpose %11, [1, 0, 2] : vector<8x4x8xf32> -> vector<4x8x8xf32>
    %13 = arith.truncf %12 : vector<4x8x8xf32> to vector<4x8x8xbf16>
    %c0_7 = arith.constant 0 : index
    %c0_8 = arith.constant 0 : index
    %c0_9 = arith.constant 0 : index
    %c0_10 = arith.constant 0 : index
    %14 = vector.load %arg5[%c0_7, %c0_8, %c0_9, %c0_10] : memref<1x1x8x16xi8, #tpu.memory_space<vmem>>, vector<1x1x8x16xi8>
    %15 = vector.shape_cast %14 : vector<1x1x8x16xi8> to vector<8x16xi8>
    %16 = arith.extsi %15 : vector<8x16xi8> to vector<8x16xi32>
    %c0_i32_11 = arith.constant 0 : i32
    %17 = vector.broadcast %c0_i32_11 : i32 to vector<8x16xi32>
    %18 = arith.cmpi eq, %16, %17 : vector<8x16xi32>
    %cst_12 = arith.constant -1.000000e+09 : f32
    %cst_13 = arith.constant 0.000000e+00 : f32
    %19 = vector.broadcast %cst_12 : f32 to vector<8x16xf32>
    %20 = vector.broadcast %cst_13 : f32 to vector<8x16xf32>
    %21 = arith.select %18, %19, %20 : vector<8x16xi1>, vector<8x16xf32>
    %c0_14 = arith.constant 0 : index
    %c0_15 = arith.constant 0 : index
    %c0_16 = arith.constant 0 : index
    %22 = vector.load %arg15[%c0_14, %c0_15, %c0_16] : memref<4x16x8xbf16, #tpu.memory_space<vmem>>, vector<4x16x8xbf16>
    "tpu.trace_start"() <{level = 10 : i32, message = "hqd,hkd->hqk"}> : () -> ()
    %cst_17 = arith.constant dense<0.000000e+00> : vector<4x8x16xf32>
    %23 = tpu.matmul %13, %22, %cst_17 {dimension_numbers = #tpu.dot_dimension_numbers<[2], [2], [1], [1], [0, 0, 0, 1, 1, 1], [0], [0]>} : vector<4x8x8xbf16>, vector<4x16x8xbf16>, vector<4x8x16xf32> -> vector<4x8x16xf32>
    "tpu.trace_stop"() : () -> ()
    %24 = vector.shape_cast %21 : vector<8x16xf32> to vector<1x8x16xf32>
    %25 = vector.broadcast %24 : vector<1x8x16xf32> to vector<4x8x16xf32>
    %26 = arith.addf %23, %25 : vector<4x8x16xf32>
    %cst_18 = arith.constant dense<0xFF800000> : vector<4x8xf32>
    %27 = vector.multi_reduction <maximumf>, %26, %cst_18 [2] : vector<4x8x16xf32> to vector<4x8xf32>
    %28 = vector.shape_cast %27 : vector<4x8xf32> to vector<4x8x1xf32>
    %29 = vector.broadcast %28 : vector<4x8x1xf32> to vector<4x8x16xf32>
    %30 = arith.subf %26, %29 : vector<4x8x16xf32>
    %31 = math.exp %30 : vector<4x8x16xf32>
    %cst_19 = arith.constant dense<0.000000e+00> : vector<4x8xf32>
    %32 = vector.multi_reduction <add>, %31, %cst_19 [2] : vector<4x8x16xf32> to vector<4x8xf32>
    %33 = vector.shape_cast %32 : vector<4x8xf32> to vector<4x8x1xf32>
    %34 = arith.truncf %31 : vector<4x8x16xf32> to vector<4x8x16xbf16>
    %c0_20 = arith.constant 0 : index
    %c0_21 = arith.constant 0 : index
    %c0_22 = arith.constant 0 : index
    %35 = vector.load %arg16[%c0_20, %c0_21, %c0_22] : memref<4x16x8xbf16, #tpu.memory_space<vmem>>, vector<4x16x8xbf16>
    "tpu.trace_start"() <{level = 10 : i32, message = "hqk,hkd->hqd"}> : () -> ()
    %cst_23 = arith.constant dense<0.000000e+00> : vector<4x8x8xf32>
    %36 = tpu.matmul %34, %35, %cst_23 {dimension_numbers = #tpu.dot_dimension_numbers<[2], [1], [1], [2], [0, 0, 0, 1, 1, 2], [0], [0]>} : vector<4x8x16xbf16>, vector<4x16x8xbf16>, vector<4x8x8xf32> -> vector<4x8x8xf32>
    "tpu.trace_stop"() : () -> ()
    %37 = tpu.reciprocal %33 {approx = true} : vector<4x8x1xf32> -> vector<4x8x1xf32>
    %38 = vector.broadcast %37 : vector<4x8x1xf32> to vector<4x8x8xf32>
    %39 = arith.mulf %36, %38 : vector<4x8x8xf32>
    %40 = tpu.transpose %39, [1, 0, 2] : vector<4x8x8xf32> -> vector<8x4x8xf32>
    %41 = vector.shape_cast %40 : vector<8x4x8xf32> to vector<8x32xf32>
    %42 = arith.truncf %41 : vector<8x32xf32> to vector<8x32xbf16>
    %c0_24 = arith.constant 0 : index
    %c0_25 = arith.constant 0 : index
    %43 = vector.load %arg12[%c0_24, %c0_25] : memref<32x32xbf16, #tpu.memory_space<vmem>>, vector<32x32xbf16>
    %cst_26 = arith.constant dense<0.000000e+00> : vector<8x32xf32>
    %44 = tpu.matmul %42, %43, %cst_26 {dimension_numbers = #tpu.dot_dimension_numbers<[1], [0], [0], [1], [0, 0, 1, 1], [], []>} : vector<8x32xbf16>, vector<32x32xbf16>, vector<8x32xf32> -> vector<8x32xf32>
    %c0_27 = arith.constant 0 : index
    %c0_28 = arith.constant 0 : index
    %45 = vector.load %arg13[%c0_27, %c0_28] : memref<1x32xf32, #tpu.memory_space<vmem>>, vector<1x32xf32>
    %46 = vector.broadcast %45 : vector<1x32xf32> to vector<8x32xf32>
    %47 = arith.addf %44, %46 : vector<8x32xf32>
    %c0_29 = arith.constant 0 : index
    %c0_30 = arith.constant 0 : index
    %c0_31 = arith.constant 0 : index
    %48 = vector.load %arg14[%c0_29, %c0_30, %c0_31] : memref<1x8x32xf32, #tpu.memory_space<vmem>>, vector<1x8x32xf32>
    %49 = vector.shape_cast %48 : vector<1x8x32xf32> to vector<8x32xf32>
    %50 = vector.shape_cast %47 : vector<8x32xf32> to vector<1x8x32xf32>
    tpu.vector_store %arg14[%c0_29, %c0_30, %c0_31], %50 {strides = array<i32>} : memref<1x8x32xf32, #tpu.memory_space<vmem>>, vector<1x8x32xf32>,
    return
  }
  func.func @transform_0(%arg0: i32, %arg1: i32) -> (i32, i32, i32) {
    %c0_i32 = arith.constant 0 : i32
    %c0_i32_0 = arith.constant 0 : i32
    return %arg0, %arg1, %c0_i32 : i32, i32, i32
  }
  func.func @transform_1(%arg0: i32, %arg1: i32) -> (i32, i32, i32) {
    %c0_i32 = arith.constant 0 : i32
    %c0_i32_0 = arith.constant 0 : i32
    %c0_i32_1 = arith.constant 0 : i32
    return %arg0, %c0_i32, %c0_i32_0 : i32, i32, i32
  }
  func.func @transform_2(%arg0: i32, %arg1: i32) -> (i32, i32, i32) {
    %c0_i32 = arith.constant 0 : i32
    %c0_i32_0 = arith.constant 0 : i32
    %c0_i32_1 = arith.constant 0 : i32
    return %arg0, %c0_i32, %c0_i32_0 : i32, i32, i32
  }
  func.func @transform_3(%arg0: i32, %arg1: i32) -> (i32, i32, i32, i32) {
    %c0_i32 = arith.constant 0 : i32
    %c0_i32_0 = arith.constant 0 : i32
    %c0_i32_1 = arith.constant 0 : i32
    return %arg0, %c0_i32, %arg1, %c0_i32_0 : i32, i32, i32, i32
  }
  func.func @transform_4(%arg0: i32, %arg1: i32) -> (i32, i32) {
    %c0_i32 = arith.constant 0 : i32
    %c0_i32_0 = arith.constant 0 : i32
    %c0_i32_1 = arith.constant 0 : i32
    return %c0_i32, %c0_i32_0 : i32, i32
  }
  func.func @transform_5(%arg0: i32, %arg1: i32) -> (i32, i32) {
    %c0_i32 = arith.constant 0 : i32
    %c0_i32_0 = arith.constant 0 : i32
    %c0_i32_1 = arith.constant 0 : i32
    return %c0_i32, %c0_i32_0 : i32, i32
  }
  func.func @transform_6(%arg0: i32, %arg1: i32) -> (i32, i32) {
    %c0_i32 = arith.constant 0 : i32
    %c0_i32_0 = arith.constant 0 : i32
    %c0_i32_1 = arith.constant 0 : i32
    return %c0_i32, %c0_i32_0 : i32, i32
  }
  func.func @transform_7(%arg0: i32, %arg1: i32) -> (i32, i32) {
    %c0_i32 = arith.constant 0 : i32
    %c0_i32_0 = arith.constant 0 : i32
    %c0_i32_1 = arith.constant 0 : i32
    return %c0_i32, %c0_i32_0 : i32, i32
  }
  func.func @transform_8(%arg0: i32, %arg1: i32) -> (i32, i32) {
    %c0_i32 = arith.constant 0 : i32
    %c0_i32_0 = arith.constant 0 : i32
    %c0_i32_1 = arith.constant 0 : i32
    return %c0_i32, %c0_i32_0 : i32, i32
  }
  func.func @transform_9(%arg0: i32, %arg1: i32) -> (i32, i32) {
    %c0_i32 = arith.constant 0 : i32
    %c0_i32_0 = arith.constant 0 : i32
    %c0_i32_1 = arith.constant 0 : i32
    return %c0_i32, %c0_i32_0 : i32, i32
  }
  func.func @transform_10(%arg0: i32, %arg1: i32) -> (i32, i32) {
    %c0_i32 = arith.constant 0 : i32
    %c0_i32_0 = arith.constant 0 : i32
    %c0_i32_1 = arith.constant 0 : i32
    return %c0_i32, %c0_i32_0 : i32, i32
  }
  func.func @transform_11(%arg0: i32, %arg1: i32) -> (i32, i32) {
    %c0_i32 = arith.constant 0 : i32
    %c0_i32_0 = arith.constant 0 : i32
    %c0_i32_1 = arith.constant 0 : i32
    return %c0_i32, %c0_i32_0 : i32, i32
  }
  func.func @transform_12(%arg0: i32, %arg1: i32) -> (i32, i32, i32) {
    %c0_i32 = arith.constant 0 : i32
    %c0_i32_0 = arith.constant 0 : i32
    return %arg0, %arg1, %c0_i32 : i32, i32, i32
  }
}

</mosaic_0001>

<bundles_post_ra>
// kernel: tpu_custom_call.1
= control target key start
LH: loop header
LB: loop body
LE: loop exit
PB: predicated region body
PF: predicated region fallthrough
CT: control target
= control target key end

     0   :  { %s3940_s0 = inlined_call_operand.hbm [shape: f32[2,16,32], index: 0, kind: input, shape index: {}]   ;;  %s3941_s1 = inlined_call_operand.hbm [shape: f32[2,16,32], index: 1, kind: input, shape index: {}]   ;;  %s3942_s2 = inlined_call_operand.hbm [shape: f32[2,16,32], index: 2, kind: input, shape index: {}]   ;;  %s3943_s3 = inlined_call_operand.hbm [shape: s8[2,1,16,16], index: 3, kind: input, shape index: {}]   ;;  %s3944_s4 = inlined_call_operand.hbm [shape: bf16[32,32], index: 4, kind: input, shape index: {}]   ;;  %s3945_s5 = inlined_call_operand.vmem [shape: f32[1,32], index: 5, kind: input, shape index: {}]   ;;  %s3946_s6 = inlined_call_operand.vmem [shape: bf16[32,32], index: 6, kind: input, shape index: {}]   ;;  %s3947_s7 = inlined_call_operand.vmem [shape: f32[1,32], index: 7, kind: input, shape index: {}]   ;;  %s3948_s8 = inlined_call_operand.hbm [shape: bf16[32,32], index: 8, kind: input, shape index: {}]   ;;  %s3949_s9 = inlined_call_operand.hbm [shape: f32[1,32], index: 9, kind: input, shape index: {}]   ;;  %s3950_s10 = inlined_call_operand.vmem [shape: bf16[32,32], index: 10, kind: input, shape index: {}]   ;;  %s3951_s11 = inlined_call_operand.vmem [shape: f32[1,32], index: 11, kind: input, shape index: {}]   ;;  %s3952_s12 = inlined_call_operand.hbm [shape: f32[2,16,32], index: 12, kind: output, shape index: {}]  }
   0x1   :  { %3981 = sst [smem:[#allocation32_spill]] %s3940_s0 }
   0x2   :  { %3982 = sst [smem:[#allocation33_spill]] %s3941_s1 }
   0x3   :  { %3983 = sst [smem:[#allocation34_spill]] %s3942_s2 }
   0x4   :  { %3984 = sst [smem:[#allocation35_spill]] %s3943_s3 }
   0x5   :  { %3985 = sst [smem:[#allocation36_spill]] %s3944_s4 }
   0x6   :  { %3986 = sst [smem:[#allocation37_spill]] %s3945_s5 }
   0x7   :  { %3987 = sst [smem:[#allocation38_spill]] %s3946_s6 }
   0x8   :  { %3988 = sst [smem:[#allocation39_spill]] %s3947_s7 }
   0x9   :  { %3989 = sst [smem:[#allocation40_spill]] %s3948_s8 }
   0xa   :  { %3990 = sst [smem:[#allocation41_spill]] %s3949_s9 }
   0xb   :  { %3991 = sst [smem:[#allocation42_spill]] %s3950_s10 }
   0xc   :  { %3992 = sst [smem:[#allocation43_spill]] %s3951_s11 }
   0xd   :  { %3993 = sst [smem:[#allocation44_spill]] %s3952_s12 }
   0xe   :  { %17 = vsyncpa [#allocation5], 0 }
   0xf   :  { %19 = vsyncpa [#allocation5 + $0x1], 0 }
  0x10   :  { %20 = vsyncpa [#allocation8], 0 }
  0x11   :  { %22 = vsyncpa [#allocation8 + $0x1], 0 }
  0x12   :  { %23 = vsyncpa [#allocation11], 0 }
  0x13   :  { %25 = vsyncpa [#allocation11 + $0x1], 0 }
  0x14   :  { %26 = vsyncpa [#allocation14], 0 }
  0x15   :  { %27 = vsyncpa [#allocation6], 0 }
  0x16   :  { %29 = vsyncpa [#allocation6 + $0x1], 0  ;;  %s3218_s21 = smov 0   ;;  %s3220_s22 = smov 0  }
  0x17   :  { %s3222_s23 = smov 0   ;;  %s3224_s24 = smov 0  }
  0x18   :  { %s3226_s25 = smov 0   ;;  %s3228_s26 = smov 0  }
  0x19   :  { %s3230_s27 = smov 0   ;;  %s3232_s28 = smov 0  }
  0x1a   :  { %s3234_s29 = smov 0   ;;  %s3236_s30 = smov 0  }
  0x1b   :  { %s3238_s13 = smov 0  }
  0x1c LB: > { %3994 = sst [smem:[#allocation23_spill]] %s3086_s22  ;;  %s3272_s14 = sadd.s32 4294967295, %s3122_s13   ;;  %s3122_s13 = sphi %s3238_s13, %s35_s13   ;;  %s3118_s30 = sphi %s3236_s30, %s4064_s30   ;;  %s3114_s29 = sphi %s3234_s29, %s4063_s29   ;;  %s3110_s28 = sphi %s3232_s28, %s4062_s28   ;;  %s3106_s27 = sphi %s3230_s27, %s4061_s27   ;;  %s3102_s26 = sphi %s3228_s26, %s4060_s26   ;;  %s3098_s25 = sphi %s3226_s25, %s4059_s25   ;;  %s3094_s24 = sphi %s3224_s24, %s4058_s24   ;;  %s3090_s23 = sphi %s3222_s23, %s4057_s23   ;;  %s3086_s22 = sphi %s3220_s22, %s4056_s22   ;;  %s3082_s21 = sphi %s3218_s21, %s4052_s21  }
  0x1d   : > { %3995 = sst [smem:[#allocation24_spill]] %s3106_s27  ;;  %p95_p0 = scmp.ne.s32.totalorder %s3086_s22, %s3082_s21 }
  0x1e   : > { %3996 = sst [smem:[#allocation25_spill]] %s3110_s28  ;;  %p3955_p1 = scmp.eq.s32.totalorder %s3272_s14, 0 }
  0x1f   : > { %3997 = sst [smem:[#allocation26_spill]] %s3272_s14  ;;  %p2409_p2 = scmp.ge.s32.totalorder %s3122_s13, 1 }
  0x20   : > { %p356_p3 = scmp.lt.s32.totalorder %s3122_s13, 5  ;;  %p3280_p4 = por %p95_p0, %p3955_p1 }
  0x21   : > { %s3124_s17 = smov [#allocation12]   ;;  %s3125_s20 = smov [#allocation13]  }
  0x22   : > { %s3998_s15 = scalar_select %p3280_p4, 1, 0 }
  0x23   : > { %p3284_p5 = pnand %p2409_p2, %p356_p3  ;;  %s368_s18 = sshll.u32 %s3124_s17, 4  ;;  %s369_s18 = int_to_ptr.vmem [resolvable:$true] %s368_s18 }
  0x24   : > { %3999 = sst [smem:[#allocation27_spill]] %s3998_s15  ;;  %s390_s21 = sshll.u32 %s3125_s20, 4  ;;  %s3296_s21 = int_to_ptr.vmem [resolvable:$true] %s390_s21 }
  0x25   : > { %s4000_s16 = scalar_select %p3284_p5, 1, 0 }
  0x26   : > { %p2609_p6 = pneg %p3284_p5  ;;  %s4003_s4 = sld [smem:[#allocation36_spill]] }
  0x27   : > { %4001 = sst [smem:[#allocation28_spill]] %s4000_s16 }
  0x28   : > { %p3292_p7 = pnand %p2609_p6, %p3955_p1 }
  0x2a   : > { %s4002_s19 = scalar_select %p3292_p7, 1, 0 }
  0x2b   : > { %p3306_p9 = pneg %p3292_p7 }
  0x2c   : > { %s2780_s28 = scalar_lea.hbm %s4003_s4, 256 }
  0x2d   : > { %p2781_p8 = scmp.ne.s32.totalorder %s4003_s4, %s2780_s28  ;;  %p2787_p12 = scmp.lt.u32.totalorder %s2780_s28, %s4003_s4 }
  0x2f   : > { %p2783_p10 = pnand %p3306_p9, %p2781_p8 }
  0x31   : > { %p2784_p11 = pneg %p2783_p10 }
  0x33   : > { %p2789_p13 = pnand %p2787_p12, %p2784_p11 }
  0x35   : > { %2792 = shalt.err (!%p2789_p13)
}
  0x36   : > { %s2793_s11 = scalar_lea.vmem %s369_s18, 256  ;;  %p2801_p6 = scmp.lt.s32.totalorder %s369_s18, %s369_s18 }
  0x37   : > { %p2794_p0 = scmp.ne.s32.totalorder %s369_s18, %s2793_s11  ;;  %p2802_p1 = scmp.lt.s32.totalorder %s2793_s11, %s2793_s11 }
  0x39   : > { %p2796_p2 = pnand %p2794_p0, %p3306_p9  ;;  %p2803_p4 = por %p2802_p1, %p2801_p6 }
  0x3b   : > { %p2797_p3 = pneg %p2796_p2 }
  0x3d   : > { %p2804_p5 = pnand %p2803_p4, %p2797_p3 }
  0x3f   : > { %2807 = shalt.err (!%p2804_p5)
}
  0x40   : > { %s3126_s5 = smov 64   ;;  %s3127_s10 = smov 4  }
  0x41   : > { %2612 = dma.hbm_to_vmem [thread:$0]  (!%p3292_p7), %s4003_s4, 256, %s369_s18, [#allocation11], %s3126_s5, %s3126_s5, %s3127_s10  }
  0x42   : > { %s4005_s8 = sld [smem:[#allocation40_spill]] }
  0x48   : > { %s2808_s6 = scalar_lea.hbm %s4005_s8, 256 }
  0x49   : > { %p2809_p8 = scmp.ne.s32.totalorder %s4005_s8, %s2808_s6  ;;  %p2815_p5 = scmp.lt.u32.totalorder %s2808_s6, %s4005_s8 }
  0x4b   : > { %p2811_p1 = pnand %p2809_p8, %p3306_p9 }
  0x4d   : > { %p2812_p4 = pneg %p2811_p1 }
  0x4f   : > { %p2817_p10 = pnand %p2815_p5, %p2812_p4 }
  0x51   : > { %2820 = shalt.err (!%p2817_p10)
}
  0x52   : > { %s2821_s18 = scalar_lea.vmem %s3296_s21, 256  ;;  %p2829_p0 = scmp.lt.s32.totalorder %s3296_s21, %s3296_s21 }
  0x53   : > { %p2822_p11 = scmp.ne.s32.totalorder %s3296_s21, %s2821_s18  ;;  %p2830_p2 = scmp.lt.s32.totalorder %s2821_s18, %s2821_s18 }
  0x55   : > { %p2824_p12 = pnand %p2822_p11, %p3306_p9  ;;  %p2831_p3 = por %p2830_p2, %p2829_p0 }
  0x57   : > { %p2825_p13 = pneg %p2824_p12 }
  0x59   : > { %p2832_p6 = pnand %p2831_p3, %p2825_p13 }
  0x5b   : > { %2835 = shalt.err (!%p2832_p6)
}
  0x5c   : > { %2615 = dma.hbm_to_vmem [thread:$0]  (!%p3292_p7), %s4005_s8, 256, %s3296_s21, [#allocation14], %s3126_s5, %s3126_s5, %s3127_s10  }
  0x5d   : > { %p3964_p8 = scmp.eq.s32.totalorder %s3122_s13, 0  ;;  %p89_p1 = scmp.ne.s32.totalorder %s3090_s23, %s3086_s22 }
  0x5e   : > { %p3962_p4 = scmp.lt.s32.totalorder %s3122_s13, 4  ;;  %s3963_s15 = sand.u32 1, %s3122_s13  }
  0x5f   : > { %s443_s16 = sand.u32 1, %s3090_s23   ;;  %p91_p5 = por %p89_p1, %p3964_p8 }
  0x60   : > { %s3353_s7 = sshll.u32 %s443_s16, 4  ;;  %s2477_s12 = sshll.u32 %s3118_s30, 8 }
  0x61   : > { %s4006_s1 = sld [smem:[#allocation33_spill]]  ;;  %s445_s21 = scalar_lea.vmem [#allocation7], %s3353_s7 }
  0x62   : > { %s452_s5 = sshll.u32 %s445_s21, 4  ;;  %p3366_p10 = pnand %p3962_p4, %p91_p5  ;;  %s3370_s5 = int_to_ptr.vmem [resolvable:$true] %s452_s5 }
  0x63   : > { %s3374_s18 = scalar_lea.sflag [#allocation8], %s3963_s15 }
  0x64   : > { %s4007_s10 = scalar_select %p3366_p10, 1, 0 }
  0x65   : > { %p3974_p12 = pneg %p3366_p10 }
  0x66   : > { %4008 = sst [smem:[#allocation29_spill]] %s4007_s10 }
  0x67   : > { %s3361_s11 = scalar_lea.hbm %s4006_s1, %s2477_s12  ;;  %s2841_s28 = scalar_lea.hbm %s4006_s1, 512 }
  0x68   : > { %s2836_s6 = scalar_lea.hbm %s3361_s11, 256  ;;  %p2842_p2 = scmp.lt.u32.totalorder %s3361_s11, %s4006_s1 }
  0x69   : > { %p2837_p11 = scmp.ne.s32.totalorder %s3361_s11, %s2836_s6  ;;  %p2843_p3 = scmp.lt.u32.totalorder %s2841_s28, %s2836_s6 }
  0x6a   : > { %p2845_p1 = scmp.lt.u32.totalorder %s2836_s6, %s3361_s11 }
  0x6b   : > { %p2839_p13 = pnand %p3974_p12, %p2837_p11  ;;  %p2844_p6 = por %p2843_p3, %p2842_p2 }
  0x6d   : > { %p2840_p0 = pneg %p2839_p13  ;;  %p2846_p5 = por %p2845_p1, %p2844_p6 }
  0x6f   : > { %p2847_p4 = pnand %p2846_p5, %p2840_p0 }
  0x71   : > { %2850 = shalt.err (!%p2847_p4)
}
  0x72   : > { %s2851_s15 = scalar_lea.vmem %s3370_s5, 256  ;;  %s3128_s27 = smov [#allocation7]  }
  0x73   : > { %p2852_p11 = scmp.ne.s32.totalorder %s3370_s5, %s2851_s15  ;;  %s2856_s16 = sshll.u32 %s3128_s27, 4  ;;  %s2857_s16 = int_to_ptr.vmem [resolvable:$false] %s2856_s16 }
  0x74   : > { %s2858_s20 = scalar_lea.vmem %s2857_s16, 512  ;;  %p2859_p7 = scmp.lt.s32.totalorder %s3370_s5, %s2857_s16 }
  0x75   : > { %p2854_p13 = pnand %p2852_p11, %p3974_p12  ;;  %p2860_p2 = scmp.lt.s32.totalorder %s2858_s20, %s2851_s15 }
  0x77   : > { %p2855_p8 = pneg %p2854_p13  ;;  %p2861_p3 = por %p2860_p2, %p2859_p7 }
  0x79   : > { %p2862_p6 = pnand %p2861_p3, %p2855_p8 }
  0x7b   : > { %2865 = shalt.err (!%p2862_p6)
}
  0x7c   : > { %s3975_s6 = smov 128   ;;  %s3976_s28 = smov 8  }
  0x7d   : > { %2625 = dma.hbm_to_vmem [thread:$0]  (!%p3366_p10), %s3361_s11, 256, %s3370_s5, %s3374_s18, %s3975_s6, %s3975_s6, %s3976_s28  }
  0x7e   : > { %s82_s21 = sadd.s32 1, %s3090_s23  ;;  %s4009_s2 = sld [smem:[#allocation34_spill]] }
  0x7f   : > { %s466_s20 = scalar_lea.vmem [#allocation9], %s3353_s7  ;;  %s3131_s4 = smov [#allocation15]  }
  0x80   : > { %s473_s1 = sshll.u32 %s466_s20, 4  ;;  %s404_s8 = sshll.u32 %s3131_s4, 4  ;;  %s405_s8 = int_to_ptr.vmem [resolvable:$true] %s404_s8  ;;  %s3432_s1 = int_to_ptr.vmem [resolvable:$true] %s473_s1 }
  0x81   : > { %s4010_s9 = sld [smem:[#allocation41_spill]] }
  0x84   : > { %s3411_s16 = scalar_lea.hbm %s4009_s2, %s2477_s12 }
  0x87   : > { %s2866_s0 = scalar_lea.hbm %s4010_s9, 16 }
  0x88   : > { %p2867_p7 = scmp.ne.s32.totalorder %s4010_s9, %s2866_s0  ;;  %p2873_p0 = scmp.lt.u32.totalorder %s2866_s0, %s4010_s9 }
  0x8a   : > { %p2869_p8 = pnand %p2867_p7, %p3306_p9 }
  0x8c   : > { %p2870_p4 = pneg %p2869_p8 }
  0x8e   : > { %p2875_p1 = pnand %p2873_p0, %p2870_p4 }
  0x90   : > { %2878 = shalt.err (!%p2875_p1)
}
  0x91   : > { %s2879_s7 = scalar_lea.vmem %s405_s8, 16  ;;  %s2886_s3 = scalar_lea.vmem %s405_s8, 32 }
  0x92   : > { %p2880_p5 = scmp.ne.s32.totalorder %s405_s8, %s2879_s7  ;;  %p2887_p2 = scmp.lt.s32.totalorder %s405_s8, %s405_s8 }
  0x93   : > { %p2888_p3 = scmp.lt.s32.totalorder %s2886_s3, %s2879_s7 }
  0x94   : > { %p2882_p11 = pnand %p2880_p5, %p3306_p9 }
  0x95   : > { %p2889_p6 = por %p2888_p3, %p2887_p2 }
  0x96   : > { %p2883_p13 = pneg %p2882_p11 }
  0x98   : > { %p2890_p12 = pnand %p2889_p6, %p2883_p13 }
  0x9a   : > { %2893 = shalt.err (!%p2890_p12)
}
  0x9b   : > { %p4011_p7 = scmp.ne.s32.totalorder %s4002_s19, 0  ;;  %s4012_s0 = sld [smem:[#allocation26_spill]] }
  0x9c   : > { %s2408_s14 = sadd.s32 4294967294, %s3122_s13   ;;  %s44_s19 = sadd.s32 1, %s3114_s29 }
  0x9d   : > { %2618 = dma.hbm_to_vmem [thread:$0]  (!%p4011_p7), %s4010_s9, 16, %s405_s8, [#allocation14]  }
  0x9e   : > { %p45_p9 = scmp.ge.s32.totalorder %s44_s19, 2  ;;  %s47_s17 = sadd.s32 1, %s3118_s30 }
  0x9f   : > { %s56_s12 = sadd.s32 1, %s3102_s26  ;;  %p69_p12 = scmp.ne.s32.totalorder %s3098_s25, %s3094_s24 }
  0xa0   : > { %s4066_s19 = smov (%p45_p9, %s44_s19), 0  ;;  %s4068_s17 = smov (!%p45_p9, %s47_s17), %s3118_s30 }
  0xa1   : > { %4013 = sst [smem:[#allocation30_spill]] %s4066_s19  ;;  %s52_s10 = ssub.s32 %s3114_s29, %s4066_s19 }
  0xa2   : > { %p63_p8 = scmp.ne.s32.totalorder %s3102_s26, %s3098_s25  ;;  %p49_p4 = scmp.ge.s32.totalorder %s4068_s17, 2 }
  0xa3   : > { %p4014_p0 = scmp.eq.s32.totalorder %s4012_s0, 0  ;;  %p343_p5 = scmp.eq.s32.totalorder %s4012_s0, 3 }
  0xa4   : > { %p349_p11 = scmp.eq.s32.totalorder %s2408_s14, 3  ;;  %s4070_s17 = smov (%p49_p4, %s4068_s17), 0 }
  0xa5   : > { %p3449_p1 = por %p4014_p0, %p69_p12  ;;  %4016 = sst [smem:[#allocation31_spill]] %s4070_s17 }
  0xa6   : > { %p3456_p13 = por %p343_p5, %p63_p8  ;;  %p3460_p2 = por %p349_p11, %p69_p12 }
  0xa7   : > { %s4015_s8 = scalar_select %p3449_p1, 1, 0 }
  0xa8   : > { %s4017_s15 = scalar_select %p3456_p13, 1, 0 }
  0xa9   : > { %s4018_s27 = scalar_select %p3460_p2, 1, 0 }
  0xaa   : > { %s51_s20 = ssub.s32 %s3118_s30, %s4070_s17  ;;  %p4019_p3 = scmp.eq.s32.totalorder %s3122_s13, 0 }
  0xab   : > { %s53_s5 = sor.u32 %s52_s10, %s51_s20  ;;  %p80_p7 = scmp.eq.s32.totalorder %s51_s20, 0 }
  0xac   : > { %p3468_p6 = por %p4019_p3, %p63_p8  ;;  %p54_p9 = scmp.eq.s32.totalorder %s53_s5, 0 }
  0xad   : > { %s3473_s3 = sand.u32 1, %s3102_s26   ;;  %s2415_s14 = sshll.u32 %s3118_s30, 1 }
  0xae   : > { %s3478_s4 = scalar_select %p80_p7, %s3090_s23, %s82_s21  }
  0xaf   : > { %s3481_s22 = scalar_select %p54_p9, %s3102_s26, %s56_s12  }
  0xb0   : > { %s2414_s0 = sshll.u32 %s3473_s3, 3  ;;  %s3486_s6 = sadd.s32 %s3114_s29, %s2415_s14 }
  0xb1   : > { %s2416_s10 = sshll.u32 %s3486_s6, 7  ;;  %s425_s28 = scalar_lea.vmem [#allocation4], %s2414_s0 }
  0xb2   : > { %s434_s20 = sshll.u32 %s425_s28, 4  ;;  %s4022_s17 = sld [smem:[#allocation32_spill]]  ;;  %s3494_s20 = int_to_ptr.vmem [resolvable:$true] %s434_s20 }
  0xb3   : > { %p4023_p12 = scmp.lt.s32.totalorder %s3122_s13, 4  ;;  %s2894_s12 = scalar_lea.hbm %s3411_s16, 256 }
  0xb4   : > { %p2895_p4 = scmp.ne.s32.totalorder %s3411_s16, %s2894_s12  ;;  %p4025_p0 = pneg %p3366_p10 }
  0xb5   : > { %p3500_p8 = pnand %p4023_p12, %p3468_p6  ;;  %s2899_s9 = scalar_lea.hbm %s4009_s2, 512 }
  0xb6   : > { %p2897_p5 = pnand %p2895_p4, %p4025_p0  ;;  %p2900_p3 = scmp.lt.u32.totalorder %s3411_s16, %s4009_s2 }
  0xb7   : > { %p2901_p7 = scmp.lt.u32.totalorder %s2899_s9, %s2894_s12  ;;  %p2903_p6 = scmp.lt.u32.totalorder %s2894_s12, %s3411_s16 }
  0xb8   : > { %s3492_s19 = scalar_lea.hbm %s4022_s17, %s2416_s10  ;;  %p2898_p11 = pneg %p2897_p5 }
  0xb9   : > { %p2902_p9 = por %p2901_p7, %p2900_p3 }
  0xbb   : > { %p2904_p12 = por %p2903_p6, %p2902_p9 }
  0xbd   : > { %p2905_p2 = pnand %p2904_p12, %p2898_p11 }
  0xbf   : > { %2908 = shalt.err (!%p2905_p2)
}
  0xc0   : > { %s2909_s11 = scalar_lea.vmem %s3432_s1, 256  ;;  %s3132_s5 = smov [#allocation9]  }
  0xc1   : > { %p2910_p4 = scmp.ne.s32.totalorder %s3432_s1, %s2909_s11  ;;  %s2914_s28 = sshll.u32 %s3132_s5, 4  ;;  %s2915_s28 = int_to_ptr.vmem [resolvable:$false] %s2914_s28 }
  0xc2   : > { %s2916_s0 = scalar_lea.vmem %s2915_s28, 512  ;;  %p2917_p1 = scmp.lt.s32.totalorder %s3432_s1, %s2915_s28 }
  0xc3   : > { %p2912_p5 = pnand %p2910_p4, %p4025_p0  ;;  %p2918_p3 = scmp.lt.s32.totalorder %s2916_s0, %s2909_s11 }
  0xc5   : > { %p2913_p13 = pneg %p2912_p5  ;;  %p2919_p7 = por %p2918_p3, %p2917_p1 }
  0xc7   : > { %p2920_p9 = pnand %p2919_p7, %p2913_p13 }
  0xc9   : > { %2923 = shalt.err (!%p2920_p9)
}
  0xca   : > { %s4026_s12 = smov 8   ;;  %s4027_s9 = smov 128  }
  0xcb   : > { %2628 = dma.hbm_to_vmem [thread:$0]  (!%p3366_p10), %s3411_s16, 256, %s3432_s1, %s3374_s18, %s4027_s9, %s4027_s9, %s4026_s12  }
  0xcc   : > { %s2425_s14 = sshll.u32 %s3486_s6, 5  ;;  %s422_s10 = scalar_lea.sflag [#allocation5], %s3473_s3 }
  0xcd   : > { %s2924_s11 = scalar_lea.hbm %s3492_s19, 128  ;;  %p2926_p13 = pneg %p3500_p8 }
  0xce   : > { %p2925_p1 = scmp.ne.s32.totalorder %s3492_s19, %s2924_s11  ;;  %s2929_s28 = scalar_lea.hbm %s4022_s17, 512 }
  0xcf   : > { %p2930_p6 = scmp.lt.u32.totalorder %s3492_s19, %s4022_s17  ;;  %p2931_p12 = scmp.lt.u32.totalorder %s2929_s28, %s2924_s11 }
  0xd0   : > { %p2927_p2 = pnand %p2926_p13, %p2925_p1  ;;  %p2933_p4 = scmp.lt.u32.totalorder %s2924_s11, %s3492_s19 }
  0xd1   : > { %p2932_p10 = por %p2931_p12, %p2930_p6 }
  0xd2   : > { %p2928_p11 = pneg %p2927_p2 }
  0xd3   : > { %p2934_p0 = por %p2933_p4, %p2932_p10 }
  0xd5   : > { %p2935_p5 = pnand %p2934_p0, %p2928_p11 }
  0xd7   : > { %2938 = shalt.err (!%p2935_p5)
}
  0xd8   : > { %s2939_s1 = scalar_lea.vmem %s3494_s20, 128  ;;  %s3133_s18 = smov [#allocation4]  }
  0xd9   : > { %p2940_p3 = scmp.ne.s32.totalorder %s3494_s20, %s2939_s1  ;;  %s2944_s16 = sshll.u32 %s3133_s18, 4  ;;  %s2945_s16 = int_to_ptr.vmem [resolvable:$false] %s2944_s16 }
  0xda   : > { %s2946_s2 = scalar_lea.vmem %s2945_s16, 256  ;;  %p2947_p1 = scmp.lt.s32.totalorder %s3494_s20, %s2945_s16 }
  0xdb   : > { %p2942_p7 = pnand %p2940_p3, %p2926_p13  ;;  %p2948_p2 = scmp.lt.s32.totalorder %s2946_s2, %s2939_s1 }
  0xdd   : > { %p2943_p9 = pneg %p2942_p7  ;;  %p2949_p6 = por %p2948_p2, %p2947_p1 }
  0xdf   : > { %p2950_p12 = pnand %p2949_p6, %p2943_p9 }
  0xe1   : > { %2953 = shalt.err (!%p2950_p12)
}
  0xe2   : > { %2622 = dma.hbm_to_vmem [thread:$0]  (!%p3500_p8), %s3492_s19, 128, %s3494_s20, %s422_s10  }
  0xe3   : > { %s2423_s12 = sshll.u32 %s3473_s3, 1  ;;  %s4028_s7 = sld [smem:[#allocation35_spill]] }
  0xe4   : > { %s487_s28 = scalar_lea.vmem [#allocation10], %s2423_s12  ;;  %s4029_s1 = sand.u32 1, %s3122_s13  }
  0xe5   : > { %s496_s0 = sshll.u32 %s487_s28, 4  ;;  %s484_s18 = scalar_lea.sflag [#allocation11], %s4029_s1  ;;  %s497_s0 = int_to_ptr.vmem [resolvable:$true] %s496_s0 }
  0xe9   : > { %s3564_s5 = scalar_lea.hbm %s4028_s7, %s2425_s14  ;;  %s2959_s3 = scalar_lea.hbm %s4028_s7, 128 }
  0xea   : > { %s2954_s16 = scalar_lea.hbm %s3564_s5, 32  ;;  %p2960_p0 = scmp.lt.u32.totalorder %s3564_s5, %s4028_s7 }
  0xeb   : > { %p2955_p11 = scmp.ne.s32.totalorder %s3564_s5, %s2954_s16  ;;  %p2961_p5 = scmp.lt.u32.totalorder %s2959_s3, %s2954_s16 }
  0xec   : > { %p2963_p7 = scmp.lt.u32.totalorder %s2954_s16, %s3564_s5 }
  0xed   : > { %p2957_p10 = pnand %p2955_p11, %p2926_p13  ;;  %p2962_p3 = por %p2961_p5, %p2960_p0 }
  0xef   : > { %p2958_p4 = pneg %p2957_p10  ;;  %p2964_p9 = por %p2963_p7, %p2962_p3 }
  0xf1   : > { %p2965_p1 = pnand %p2964_p9, %p2958_p4 }
  0xf3   : > { %2968 = shalt.err (!%p2965_p1)
}
  0xf4   : > { %s2969_s10 = scalar_lea.vmem %s497_s0, 32  ;;  %s3134_s2 = smov [#allocation10]  }
  0xf5   : > { %p2970_p2 = scmp.ne.s32.totalorder %s497_s0, %s2969_s10  ;;  %s2974_s12 = sshll.u32 %s3134_s2, 4  ;;  %s2975_s12 = int_to_ptr.vmem [resolvable:$false] %s2974_s12 }
  0xf6   : > { %s2976_s9 = scalar_lea.vmem %s2975_s12, 64  ;;  %p2977_p11 = scmp.lt.s32.totalorder %s497_s0, %s2975_s12 }
  0xf7   : > { %p2972_p6 = pnand %p2970_p2, %p2926_p13  ;;  %p2978_p10 = scmp.lt.s32.totalorder %s2976_s9, %s2969_s10 }
  0xf9   : > { %p2973_p12 = pneg %p2972_p6  ;;  %p2979_p0 = por %p2978_p10, %p2977_p11 }
  0xfb   : > { %p2980_p5 = pnand %p2979_p0, %p2973_p12 }
  0xfd   : > { %2983 = shalt.err (!%p2980_p5)
}
  0xfe   : > { %2631 = dma.hbm_to_vmem [thread:$0]  (!%p3500_p8), %s3564_s5, 32, %s497_s0, %s484_s18  }
  0xff   : > { %s4030_s11 = sld [smem:[#allocation28_spill]] }
 0x105   : > { %p4031_p4 = scmp.ne.s32.totalorder %s4030_s11, 0 }
 0x106   : > { %s3590_s28 = sand.u32 (!%p4031_p4), 1, %s3098_s25   ;;  %p4032_p13 = scmp.ne.s32.totalorder (!%p4031_p4), %s4015_s8, 0 }
 0x107   : > { %505 = sbr.rel (%p4031_p4) target bundleno = 2022 (0x7e6), region = 68  ;;  %s2427_s1 = sshll.u32 (!%p4031_p4), %s3590_s28, 3 }
 0x108   : > { %s508_s16 = scalar_lea.sflag (!%p4031_p4), [#allocation5], %s3590_s28  ;;  %s3594_s6 = scalar_lea.vmem (!%p4031_p4), [#allocation4], %s2427_s1 }
 0x10e   : > { %3057 = dma.done.wait (%p4032_p13), %s508_s16, 128  }
 0x10f   : > { %3059 = vsyncadd (%p4032_p13), %s508_s16, 4294967168  ;;  %s4033_s21 = sld [smem:[#allocation26_spill]]  ;;  %s4034_s5 = sld [smem:[#allocation23_spill]] }
 0x110   : > { %s4035_s0 = sld [smem:[#allocation27_spill]] }
 0x115   : > { %s516_s18 = sand.u32 1, %s4033_s21   ;;  %s518_s19 = sand.u32 1, %s4034_s5  }
 0x116   : > { %s3602_s3 = sshll.u32 %s518_s19, 4  ;;  %s517_s20 = scalar_lea.sflag [#allocation8], %s516_s18 }
 0x117   : > { %s520_s14 = scalar_lea.vmem [#allocation7], %s3602_s3  ;;  %p4036_p8 = scmp.ne.s32.totalorder %s4035_s0, 0 }
 0x119   : > { %3061 = dma.done.wait (%p4036_p8), %s517_s20, 512  }
 0x11a   : > { %3063 = vsyncadd (%p4036_p8), %s517_s20, 4294966784  ;;  %s2430_s10 = sshll.u32 %s3590_s28, 1  ;;  %s529_s2 = scalar_lea.vmem [#allocation9], %s3602_s3 }
 0x11b   : > { %s535_s12 = scalar_lea.sflag [#allocation11], %s516_s18  ;;  %s3611_s9 = scalar_lea.vmem [#allocation10], %s2430_s10 }
 0x11c   : > { %3065 = dma.done.wait (%p4032_p13), %s535_s12, 32  }
 0x11d   : > { %3067 = vsyncadd (%p4032_p13), %s535_s12, 4294967264  ;;  %p4037_p3 = scmp.eq.s32.totalorder %s4033_s21, 0 }
 0x11f   : > { %3069 = dma.done.wait (%p4037_p3), [#allocation11], 256   ;;  %p4038_p7 = pmov %p4037_p3 }
 0x120   : > { %p4039_p9 = pmov %p4037_p3 }
 0x121   : > { %3071 = vsyncadd (%p4038_p7), [#allocation11], 4294967040 }
 0x122   : > { %3073 = dma.done.wait (%p4039_p9), [#allocation14], 272   ;;  %p4040_p1 = pmov %p4037_p3 }
 0x123   : > { %s3625_s11 = scalar_lea.vmem [#allocation16], %s2427_s1  ;;  %s4041_s16 = sld [smem:[#allocation24_spill]] }
 0x124   : > { %3075 = vsyncadd (%p4040_p1), [#allocation14], 4294967024 }
 0x129   : > { %p2435_p2 = scmp.ne.s32.totalorder %s4041_s16, 0 }
 0x12a   : > { %s4042_s0 = sld [smem:[#allocation38_spill]] (!%p2435_p2)  ;;  %v3135_v1 = vmov (!%p2435_p2), 0.0   ;;  %v2758_v3 = vld [vmem:[#allocation13] sm:$0xff] (!%p2435_p2)   ;;  %vm3136_vm0 = vmmov (!%p2435_p2), 0   ;;  %v2759_v6 = vld [vmem:[#allocation13 + $0x8] sm:$0xff] (!%p2435_p2)   ;;  %vm640_vm1 = vcmask (!%p2435_p2), 261120   ;;  %v777_v27 = vlaneseq (!%p2435_p2) }
 0x12b   : > { %610 = sbr.rel (%p2435_p2) target bundleno = 695 (0x2b7), region = 100  ;;  %2507 = vmatprep.subr.bf16.mxu0 (!%p2435_p2), %v3135_v1  ;;  %2515 = vmatprep.subr.bf16.mxu1 (!%p2435_p2), %v3135_v1  ;;  %v611_v4 = vld [vmem:[%s520_s14] sm:$0xff] (!%p2435_p2)  ;;  %v612_v5 = vld [vmem:[%s520_s14 + $0x8] sm:$0xff] (!%p2435_p2)  ;;  %s4043_s3 = sld [smem:[#allocation39_spill]] (!%p2435_p2)  ;;  %v3140_v25 = vmov (!%p2435_p2), 1983009808  }
 0x12c   : > { %2511 = vmatprep.mubr.msk.bf16.mxu0 (!%p2435_p2), %vm3136_vm0, %v3135_v1  ;;  %2519 = vmatprep.mubr.msk.bf16.mxu1 (!%p2435_p2), %vm3136_vm0, %v3135_v1  ;;  %v614_v7 = vld [vmem:[%s529_s2] sm:$0xff] (!%p2435_p2)  ;;  %v613_v8 = vpack.c.bf16 (!%p2435_p2), %v612_v5, %v611_v4  ;;  %v615_v9 = vld [vmem:[%s529_s2 + $0x8] sm:$0xff] (!%p2435_p2)  ;;  %s3137_s20 = smov (!%p2435_p2), 112   ;;  %s3138_s14 = smov (!%p2435_p2), 120   ;;  %v775_v26 = vunpack.c.l.s4 (!%p2435_p2), %v3140_v25  ;;  %v3141_v28 = vmov (!%p2435_p2), 1934713408  }
 0x12d   : > { %2516 = vmatpush3.bf16.msra.mxu1 (!%p2435_p2), %v2758_v3  ;;  %v616_v10 = vpack.c.bf16 (!%p2435_p2), %v615_v9, %v614_v7  ;;  %v2440_v19 = vld [vmem:[#allocation15] ss:$0 sm:$0xff] (!%p2435_p2)  ;;  %s3139_s10 = smov (!%p2435_p2), 104   ;;  %v807_v29 = vunpack.c.l.s4 (!%p2435_p2), %v3141_v28  ;;  %v778_v31 = vshrl.u32 (!%p2435_p2), %v777_v27, 7  ;;  %vm1048_vm2 = vcmask (!%p2435_p2), 64512  }
 0x12e   : > { %2517 = vmatprep.subr.bf16.mxu1 (!%p2435_p2), %v3135_v1  ;;  %v776_v30 = vunpack.c.0.s8 (!%p2435_p2), %v775_v26 }
 0x12f   : > { %v808_v34 = vunpack.c.0.s8 (!%p2435_p2), %v807_v29 }
 0x130   : > { %v2756_v0 = vld [vmem:[%s4042_s0] sm:$0xff] (!%p2435_p2)   ;;  %v2757_v2 = vld [vmem:[%s4042_s0 + $0x8] sm:$0xff] (!%p2435_p2)   ;;  %v3652_v35 = vsub.s32 (!%p2435_p2), %v776_v30, %v778_v31 }
 0x131   : > { %2508 = vmatpush3.bf16.msra.mxu0 (!%p2435_p2), %v2756_v0  ;;  %2518 = vmatpush3.bf16.msra.mxu1 (!%p2435_p2), %v2759_v6  ;;  %v2436_v11 = vld [vmem:[%s4043_s3] ss:$0 sm:$0xff] (!%p2435_p2)  ;;  %v3654_v42 = vsub.s32 (!%p2435_p2), %v808_v34, %v778_v31 }
 0x132   : > { %2509 = vmatprep.subr.bf16.mxu0 %v3135_v1 }
 0x134   : > { %2520 = vmatmul.mubr.msk.bf16.vlgmr.msra.gmra.mrb[0].mxu1 %vm640_vm1, %v616_v10 }
 0x135   : > { %2510 = vmatpush3.bf16.msra.mxu0 %v2757_v2 }
 0x138   : > { %2512 = vmatmul.mubr.msk.bf16.vlgmr.msra.gmra.mrb[0].mxu0 %vm640_vm1, %v613_v8 }
 0x207   : > { %v745_v16 = vpop.f32.mrb[0].mxu1 }
 0x208   : > { %v2521_v18 = vpop.f32.mrb[1].mxu1  ;;  %v3639_v23 = vadd.f32 %v2440_v19, %v745_v16 }
 0x209   : > { %v748_v20 = vpop.f32.mrb[2].mxu1 }
 0x20a   : > { %v2522_v22 = vpop.f32.mrb[3].mxu1  ;;  %v3644_v24 = vadd.f32 %v2440_v19, %v748_v20 }
 0x20b   : > { %v678_v12 = vpop.f32.mrb[0].mxu0 }
 0x20c   : > { %v679_v13 = vadd.f32 %v2436_v11, %v678_v12  ;;  %v2513_v14 = vpop.f32.mrb[1].mxu0 }
 0x20d   : > { %v681_v15 = vpop.f32.mrb[2].mxu0 }
 0x20e   : > { %760 = vrot.lane.b32.xlu1 %v679_v13, %s3137_s20  ;;  %754 = vrot.lane.b32.xlu0 %v679_v13, %s3138_s14  ;;  %v2514_v17 = vpop.f32.mrb[3].mxu0  ;;  %v3637_v21 = vadd.f32 %v2436_v11, %v681_v15 }
 0x212   : > { %766 = vrot.lane.b32.xlu0 %v679_v13, %s3139_s10  ;;  %762 = vrot.lane.b32.xlu1 %v3637_v21, %s3137_s20 }
 0x216   : > { %1055 = vrot.lane.b32.xlu0 %v3639_v23, %s3138_s14  ;;  %768 = vrot.lane.b32.xlu1 %v3637_v21, %s3139_s10 }
 0x21a   : > { %1061 = vrot.lane.b32.xlu0 %v3639_v23, %s3137_s20  ;;  %1057 = vrot.lane.b32.xlu1 %v3644_v24, %s3138_s14 }
 0x21e   : > { %1063 = vrot.lane.b32.xlu1 %v3644_v24, %s3137_s20  ;;  %756 = vrot.lane.b32.xlu0 %v3637_v21, %s3138_s14 }
 0x222   : > { %1069 = vrot.lane.b32.xlu1 %v3644_v24, %s3139_s10  ;;  %1067 = vrot.lane.b32.xlu0 %v3639_v23, %s3139_s10 }
 0x280   : > { %v761_v32 = vpop.permute.xlu1 %760  ;;  %v755_v33 = vpop.permute.xlu0 %754 }
 0x281   : > { %v772_v36 = vcombine.low %v679_v13, %v761_v32  ;;  %v773_v37 = vcombine.high %v679_v13, %v761_v32 }
 0x283   : > { %v780_v43 = vrot.slane %v772_v36, %v3652_v35  ;;  %v787_v44 = vrot.slane %v773_v37, %v3652_v35 }
 0x284   : > { %v767_v38 = vpop.permute.xlu0 %766  ;;  %v763_v39 = vpop.permute.xlu1 %762 }
 0x285   : > { %v788_v40 = vcombine.low %v755_v33, %v767_v38  ;;  %v789_v41 = vcombine.high %v755_v33, %v767_v38  ;;  %v840_v63 = vcombine.low %v3637_v21, %v763_v39  ;;  %v841_v0 = vcombine.high %v3637_v21, %v763_v39 }
 0x287   : > { %v796_v45 = vrot.slane %v788_v40, %v3652_v35  ;;  %v803_v46 = vrot.slane %v789_v41, %v3652_v35  ;;  %v848_v19 = vrot.slane %v840_v63, %v3652_v35  ;;  %v855_v20 = vrot.slane %v841_v0, %v3652_v35 }
 0x288   : > { %v3660_v47 = vpop.permute.xlu0 %1055  ;;  %v769_v48 = vpop.permute.xlu1 %768 }
 0x289   : > { %v804_v49 = vcombine.low %v780_v43, %v796_v45  ;;  %v805_v50 = vcombine.high %v780_v43, %v796_v45  ;;  %v820_v51 = vcombine.low %v787_v44, %v803_v46  ;;  %v821_v52 = vcombine.high %v787_v44, %v803_v46 }
 0x28b   : > { %v812_v53 = vrot.slane %v804_v49, %v3654_v42  ;;  %v819_v54 = vrot.slane %v805_v50, %v3654_v42  ;;  %v828_v55 = vrot.slane %v820_v51, %v3654_v42  ;;  %v835_v56 = vrot.slane %v821_v52, %v3654_v42 }
 0x28c   : > { %v1062_v57 = vpop.permute.xlu0 %1061  ;;  %v1058_v58 = vpop.permute.xlu1 %1057 }
 0x28d   : > { %v908_v59 = vcombine.low %v812_v53, %v819_v54  ;;  %v2444_v60 = vcombine.high %v812_v53, %v819_v54  ;;  %v924_v61 = vcombine.low %v828_v55, %v835_v56  ;;  %v2445_v62 = vcombine.high %v828_v55, %v835_v56 }
 0x28e   : > { %v1073_v5 = vcombine.low %v3639_v23, %v1062_v57  ;;  %v1074_v6 = vcombine.high %v3639_v23, %v1062_v57 }
 0x28f   : > { %v915_v1 = vrot.slane %v908_v59, %v3652_v35  ;;  %v923_v2 = vrot.slane %v2444_v60, %v3652_v35  ;;  %v931_v3 = vrot.slane %v924_v61, %v3652_v35  ;;  %v939_v4 = vrot.slane %v2445_v62, %v3652_v35 }
 0x290   : > { %v1064_v7 = vpop.permute.xlu1 %1063  ;;  %v757_v8 = vpop.permute.xlu0 %756  ;;  %v3685_v21 = vrot.slane %v1073_v5, %v3652_v35  ;;  %v3688_v22 = vrot.slane %v1074_v6, %v3652_v35 }
 0x291   : > { %v940_v9 = vcombine.low %v915_v1, %v923_v2  ;;  %v941_v10 = vcombine.high %v915_v1, %v923_v2  ;;  %v956_v11 = vcombine.low %v931_v3, %v939_v4  ;;  %v957_v12 = vcombine.high %v931_v3, %v939_v4 }
 0x292   : > { %v1141_v13 = vcombine.low %v3644_v24, %v1064_v7  ;;  %v1142_v14 = vcombine.high %v3644_v24, %v1064_v7  ;;  %v856_v15 = vcombine.low %v757_v8, %v769_v48  ;;  %v857_v16 = vcombine.high %v757_v8, %v769_v48 }
 0x293   : > { %v3677_v17 = vrot.slane %v940_v9, %v3654_v42  ;;  %v3680_v18 = vrot.slane %v956_v11, %v3654_v42  ;;  %v3693_v26 = vrot.slane %v941_v10, %v3654_v42  ;;  %v3696_v27 = vrot.slane %v957_v12, %v3654_v42 }
 0x294   : > { %v864_v23 = vrot.slane %v856_v15, %v3652_v35  ;;  %v871_v24 = vrot.slane %v857_v16, %v3652_v35  ;;  %v1070_v25 = vpop.permute.xlu1 %1069  ;;  %v1149_v28 = vrot.slane %v1141_v13, %v3652_v35  ;;  %v1156_v29 = vrot.slane %v1142_v14, %v3652_v35  ;;  %v1068_v34 = vpop.permute.xlu0 %1067 }
 0x295   : > { %v972_v36 = vcombine.low %v3677_v17, %v3680_v18  ;;  %v973_v37 = vcombine.high %v3677_v17, %v3680_v18  ;;  %v1157_v38 = vcombine.low %v1058_v58, %v1070_v25  ;;  %v1158_v39 = vcombine.high %v1058_v58, %v1070_v25 }
 0x296   : > { %v872_v30 = vcombine.low %v848_v19, %v864_v23  ;;  %v873_v31 = vcombine.high %v848_v19, %v864_v23  ;;  %v888_v32 = vcombine.low %v855_v20, %v871_v24  ;;  %v889_v33 = vcombine.high %v855_v20, %v871_v24 }
 0x297   : > { %v1165_v45 = vrot.slane %v1157_v38, %v3652_v35  ;;  %v1172_v46 = vrot.slane %v1158_v39, %v3652_v35  ;;  %v1089_v48 = vcombine.low %v3660_v47, %v1068_v34  ;;  %v1090_v49 = vcombine.high %v3660_v47, %v1068_v34 }
 0x298   : > { %v880_v40 = vrot.slane %v872_v30, %v3654_v42  ;;  %v887_v41 = vrot.slane %v873_v31, %v3654_v42  ;;  %v896_v43 = vrot.slane %v888_v32, %v3654_v42  ;;  %v903_v44 = vrot.slane %v889_v33, %v3654_v42 }
 0x299   : > { %v1173_v54 = vcombine.low %v1149_v28, %v1165_v45  ;;  %v1174_v55 = vcombine.high %v1149_v28, %v1165_v45  ;;  %v1189_v56 = vcombine.low %v1156_v29, %v1172_v46  ;;  %v1190_v57 = vcombine.high %v1156_v29, %v1172_v46 }
 0x29a   : > { %v976_v50 = vcombine.low %v880_v40, %v887_v41  ;;  %v2446_v51 = vcombine.high %v880_v40, %v887_v41  ;;  %v992_v52 = vcombine.low %v896_v43, %v903_v44  ;;  %v2447_v53 = vcombine.high %v896_v43, %v903_v44 }
 0x29b   : > { %v1181_v62 = vrot.slane %v1173_v54, %v3654_v42  ;;  %v1188_v47 = vrot.slane %v1174_v55, %v3654_v42  ;;  %v1197_v63 = vrot.slane %v1189_v56, %v3654_v42  ;;  %v1204_v0 = vrot.slane %v1190_v57, %v3654_v42 }
 0x29c   : > { %v983_v58 = vrot.slane %v976_v50, %v3652_v35  ;;  %v991_v59 = vrot.slane %v2446_v51, %v3652_v35  ;;  %v999_v60 = vrot.slane %v992_v52, %v3652_v35  ;;  %v1007_v61 = vrot.slane %v2447_v53, %v3652_v35 }
 0x29d   : > { %v1277_v5 = vcombine.low %v1181_v62, %v1188_v47  ;;  %v2450_v6 = vcombine.high %v1181_v62, %v1188_v47  ;;  %v1293_v7 = vcombine.low %v1197_v63, %v1204_v0  ;;  %v2451_v8 = vcombine.high %v1197_v63, %v1204_v0 }
 0x29e   : > { %v1008_v1 = vcombine.low %v983_v58, %v991_v59  ;;  %v1009_v2 = vcombine.high %v983_v58, %v991_v59  ;;  %v1024_v3 = vcombine.low %v999_v60, %v1007_v61  ;;  %v1025_v4 = vcombine.high %v999_v60, %v1007_v61 }
 0x29f   : > { %v974_v13 = vcombine.low %v3693_v26, %v3696_v27  ;;  %v975_v14 = vcombine.high %v3693_v26, %v3696_v27  ;;  %v1097_v15 = vrot.slane %v1089_v48, %v3652_v35  ;;  %v1104_v16 = vrot.slane %v1090_v49, %v3652_v35 }
 0x2a0   : > { %v1016_v9 = vrot.slane %v1008_v1, %v3654_v42  ;;  %v1023_v10 = vrot.slane %v1009_v2, %v3654_v42  ;;  %v1032_v11 = vrot.slane %v1024_v3, %v3654_v42  ;;  %v1039_v12 = vrot.slane %v1025_v4, %v3654_v42 }
 0x2a1   : > { %v1284_v23 = vrot.slane %v1277_v5, %v3652_v35  ;;  %v1292_v24 = vrot.slane %v2450_v6, %v3652_v35  ;;  %v1300_v25 = vrot.slane %v1293_v7, %v3652_v35  ;;  %v1308_v28 = vrot.slane %v2451_v8, %v3652_v35 }
 0x2a2   : > { %v1040_v17 = vcombine.low %v1016_v9, %v1032_v11  ;;  %v1041_v18 = vcombine.high %v1016_v9, %v1032_v11  ;;  %v1042_v19 = vcombine.low %v1023_v10, %v1039_v12  ;;  %v1043_v20 = vcombine.high %v1023_v10, %v1039_v12 }
 0x2a3   : > { %v1105_v27 = vcombine.low %v3685_v21, %v1097_v15  ;;  %v1106_v32 = vcombine.high %v3685_v21, %v1097_v15  ;;  %v1121_v33 = vcombine.low %v3688_v22, %v1104_v16  ;;  %v1122_v34 = vcombine.high %v3688_v22, %v1104_v16 }
 0x2a4   : > { %v1044_v29 = vpack.c.bf16 %v1040_v17, %v972_v36  ;;  %v1045_v30 = vpack.c.bf16 %v1041_v18, %v973_v37  ;;  %v1046_v31 = vpack.c.bf16 %v1042_v19, %v974_v13  ;;  %v1047_v26 = vpack.c.bf16 %v1043_v20, %v975_v14 }
 0x2a5   : > { %v1309_v36 = vcombine.low %v1284_v23, %v1292_v24  ;;  %v1310_v37 = vcombine.high %v1284_v23, %v1292_v24  ;;  %v1325_v38 = vcombine.low %v1300_v25, %v1308_v28  ;;  %v1326_v39 = vcombine.high %v1300_v25, %v1308_v28 }
 0x2a6   : > { %1049 = vst.msk [vmem:[#allocation2] sm:$0xff] %vm1048_vm2, %v1044_v29  ;;  %1050 = vst.msk [vmem:[#allocation2 + $0x8] sm:$0xff] %vm1048_vm2, %v1045_v30  ;;  %v1113_v40 = vrot.slane %v1105_v27, %v3654_v42  ;;  %v1120_v41 = vrot.slane %v1106_v32, %v3654_v42  ;;  %v1129_v43 = vrot.slane %v1121_v33, %v3654_v42 }
 0x2a7   : > { %1051 = vst.msk [vmem:[#allocation2 + $0x10] sm:$0xff] %vm1048_vm2, %v1046_v31  ;;  %1052 = vst.msk [vmem:[#allocation2 + $0x18] sm:$0xff] %vm1048_vm2, %v1047_v26  ;;  %v1136_v44 = vrot.slane %v1122_v34, %v3654_v42  ;;  %v1317_v49 = vrot.slane %v1309_v36, %v3654_v42  ;;  %v1324_v22 = vrot.slane %v1310_v37, %v3654_v42 }
 0x2a8   : > { %v1209_v45 = vcombine.low %v1113_v40, %v1120_v41  ;;  %v2448_v46 = vcombine.high %v1113_v40, %v1120_v41  ;;  %v1333_v50 = vrot.slane %v1325_v38, %v3654_v42  ;;  %v1340_v51 = vrot.slane %v1326_v39, %v3654_v42 }
 0x2a9   : > { %v1225_v48 = vcombine.low %v1129_v43, %v1136_v44  ;;  %v2449_v21 = vcombine.high %v1129_v43, %v1136_v44 }
 0x2aa   : > { %v1216_v52 = vrot.slane %v1209_v45, %v3652_v35  ;;  %v1224_v53 = vrot.slane %v2448_v46, %v3652_v35  ;;  %v1341_v60 = vcombine.low %v1317_v49, %v1333_v50  ;;  %v1342_v61 = vcombine.high %v1317_v49, %v1333_v50 }
 0x2ab   : > { %v1232_v54 = vrot.slane %v1225_v48, %v3652_v35  ;;  %v1240_v55 = vrot.slane %v2449_v21, %v3652_v35  ;;  %v1343_v62 = vcombine.low %v1324_v22, %v1340_v51  ;;  %v1344_v47 = vcombine.high %v1324_v22, %v1340_v51 }
 0x2ac   : > { %v1241_v56 = vcombine.low %v1216_v52, %v1224_v53  ;;  %v1242_v57 = vcombine.high %v1216_v52, %v1224_v53 }
 0x2ad   : > { %v1257_v58 = vcombine.low %v1232_v54, %v1240_v55  ;;  %v1258_v59 = vcombine.high %v1232_v54, %v1240_v55 }
 0x2ae   : > { %v1249_v63 = vrot.slane %v1241_v56, %v3654_v42  ;;  %v1256_v0 = vrot.slane %v1242_v57, %v3654_v42 }
 0x2af   : > { %v1265_v1 = vrot.slane %v1257_v58, %v3654_v42  ;;  %v1272_v2 = vrot.slane %v1258_v59, %v3654_v42 }
 0x2b1   : > { %v1273_v3 = vcombine.low %v1249_v63, %v1265_v1  ;;  %v1274_v4 = vcombine.high %v1249_v63, %v1265_v1  ;;  %v1275_v5 = vcombine.low %v1256_v0, %v1272_v2  ;;  %v1276_v35 = vcombine.high %v1256_v0, %v1272_v2 }
 0x2b3   : > { %v1345_v6 = vpack.c.bf16 %v1341_v60, %v1273_v3  ;;  %v1346_v7 = vpack.c.bf16 %v1342_v61, %v1274_v4  ;;  %v1347_v8 = vpack.c.bf16 %v1343_v62, %v1275_v5  ;;  %v1348_v9 = vpack.c.bf16 %v1344_v47, %v1276_v35 }
 0x2b5   : > { %1349 = vst.msk [vmem:[#allocation3] sm:$0xff] %vm1048_vm2, %v1345_v6  ;;  %1350 = vst.msk [vmem:[#allocation3 + $0x8] sm:$0xff] %vm1048_vm2, %v1346_v7 }
 0x2b6   : > { %1351 = vst.msk [vmem:[#allocation3 + $0x10] sm:$0xff] %vm1048_vm2, %v1347_v8  ;;  %1352 = vst.msk [vmem:[#allocation3 + $0x18] sm:$0xff] %vm1048_vm2, %v1348_v9 }
 0x2b7 PF: > { %v2760_v10 = vld [vmem:[#allocation12] sm:$0xff]   ;;  %v3142_v42 = vmov 0.0   ;;  %v2761_v11 = vld [vmem:[#allocation12 + $0x8] sm:$0xff]   ;;  %vm3143_vm3 = vmmov 0   ;;  %vm1378_vm4 = vcmask 261120   ;;  %s4044_s16 = sld [smem:[#allocation37_spill]]  ;;  %v1437_v30 = vlaneseq }
 0x2b8   : > { %2523 = vmatprep.subr.bf16.mxu0 %v3142_v42  ;;  %2531 = vmatprep.subr.bf16.mxu1 %v3142_v42  ;;  %v1353_v12 = vld [vmem:[%s3594_s6] sm:$0xff]  ;;  %s3144_s6 = smov 104   ;;  %s3145_s5 = smov 120   ;;  %vm1580_vm5 = vcmask 64512   ;;  %v3147_v28 = vmov 1983009808  }
 0x2b9   : > { %2524 = vmatpush3.bf16.msra.mxu0 %v2760_v10  ;;  %2527 = vmatprep.mubr.msk.bf16.mxu0 %vm3143_vm3, %v3142_v42  ;;  %v1354_v13 = vpack.c.bf16 %v1353_v12, %v1353_v12  ;;  %v1576_v20 = vld [vmem:[#allocation2] sm:$0xff]  ;;  %v1577_v23 = vld [vmem:[#allocation2 + $0x8] sm:$0xff]  ;;  %s3146_s8 = smov 112   ;;  %v1435_v29 = vunpack.c.l.s4 %v3147_v28  ;;  %v3148_v31 = vmov 1934713408   ;;  %v1438_v32 = vshrl.u32 %v1437_v30, 7 }
 0x2ba   : > { %2525 = vmatprep.subr.bf16.mxu0 %v3142_v42  ;;  %2533 = vmatprep.mubr.msk.bf16.mxu1 %vm3143_vm3, %v3142_v42  ;;  %v1585_v24 = vsel %vm1580_vm5, %v1576_v20, 0  ;;  %v1631_v25 = vsel %vm1580_vm5, %v1577_v23, 0  ;;  %v1467_v26 = vunpack.c.l.s4 %v3148_v31  ;;  %v1578_v5 = vld [vmem:[#allocation2 + $0x10] sm:$0xff]  ;;  %v1579_v35 = vld [vmem:[#allocation2 + $0x18] sm:$0xff]  ;;  %vm1765_vm7 = vcmask 130048   ;;  %s4045_s19 = sld [smem:[#allocation42_spill]] }
 0x2bb   : > { %2532 = vmatpush3.bf16.xpose.msra.mxu1 %v1585_v24  ;;  %v1436_v27 = vunpack.c.0.s8 %v1435_v29  ;;  %v1677_v8 = vsel %vm1580_vm5, %v1578_v5, 0  ;;  %v1723_v9 = vsel %vm1580_vm5, %v1579_v35, 0  ;;  %s4046_s3 = sld [smem:[#allocation25_spill]]  ;;  %s3149_s20 = smov 16   ;;  %vm2140_vm8 = vcmask 195584  }
 0x2bc   : > { %2543 = vmatprep.subr.bf16.mxu1 %v3142_v42  ;;  %v1468_v36 = vunpack.c.0.s8 %v1467_v26  ;;  %s4047_s14 = sld [smem:[#allocation24_spill]]  ;;  %s3150_s10 = smov 8  }
 0x2bd   : > { %2526 = vmatpush3.bf16.msra.mxu0 %v2761_v11  ;;  %v2452_v14 = vld [vmem:[%s4044_s16] ss:$0 sm:$0xff]  ;;  %v3781_v37 = vsub.s32 %v1436_v27, %v1438_v32  ;;  %v1809_v35 = vld [vmem:[#allocation3 + $0x18] sm:$0xff]  ;;  %s3151_s2 = smov 24   ;;  %s2226_s18 = sshll.u32 %s3625_s11, 4  ;;  %s3877_s18 = int_to_ptr.vmem [resolvable:$true] %s2226_s18 }
 0x2be   : > { %2537 = vmatprep.subr.bf16.mxu0 %v3142_v42  ;;  %v3783_v44 = vsub.s32 %v1468_v36, %v1438_v32  ;;  %p4050_p12 = scmp.ne.s32.totalorder %s4017_s15, 0 }
 0x2c0   : > { %2528 = vmatmul.mubr.msk.bf16.vlgmr.msra.gmra.mrb[0].mxu0 %vm1378_vm4, %v1354_v13 }
 0x2c1   : > { %2539 = vmatprep.mubr.msk.bf16.mxu0 %vm3143_vm3, %v3142_v42  ;;  %s2473_s12 = sshll.u32 %s4046_s3, 1  ;;  %s2211_s3 = scalar_lea.sflag [#allocation6], %s3590_s28 }
 0x2c2   : > { %s2222_s16 = sadd.s32 %s4047_s14, %s2473_s12  ;;  %s2984_s14 = scalar_lea.vmem %s3877_s18, 128 }
 0x2c3   : > { %p2985_p6 = scmp.ne.s32.totalorder %s3877_s18, %s2984_s14 }
 0x2c5   : > { %p2986_p11 = pnand %p2985_p6, %p4050_p12 }
 0x2c6   : > { %2538 = vmatpush3.bf16.xpose.msra.mxu0 %v1631_v25 }
 0x2c7   : > { %2549 = vmatprep.subr.bf16.mxu0 %v3142_v42  ;;  %p2987_p10 = pneg %p2986_p11 }
 0x393   : > { %v1416_v15 = vpop.f32.mrb[0].mxu0 }
 0x394   : > { %v1417_v16 = vadd.f32 %v2452_v14, %v1416_v15  ;;  %v2529_v17 = vpop.f32.mrb[1].mxu0 }
 0x395   : > { %v1419_v18 = vpop.f32.mrb[2].mxu0 }
 0x396   : > { %1429 = vrot.lane.b32.xlu1 %v1417_v16, %s3144_s6  ;;  %1423 = vrot.lane.b32.xlu0 %v1417_v16, %s3145_s5  ;;  %v2530_v19 = vpop.f32.mrb[3].mxu0  ;;  %v1572_v18 = vld [vmem:[%s3611_s9] sm:$0x3]  ;;  %s2474_s9 = sshll.u32 %s2222_s16, 7 }
 0x397   : > { %v1573_v19 = vunpack.c.0.s8 %v1572_v18 }
 0x399   : > { %vm1574_vm6 = vcmp.eq.s32.totalorder %v1573_v19, 0 }
 0x39a   : > { %1426 = vrot.lane.b32.xlu0 %v1417_v16, %s3146_s8  ;;  %v1575_v20 = vsel %vm1574_vm6, -1e+09, %v3142_v42  ;;  %s4048_s8 = sld [smem:[#allocation43_spill]] }
 0x408   : > { %v1430_v33 = vpop.permute.xlu1 %1429  ;;  %v1424_v34 = vpop.permute.xlu0 %1423 }
 0x409   : > { %v1448_v38 = vcombine.low %v1424_v34, %v1430_v33  ;;  %v1449_v39 = vcombine.high %v1424_v34, %v1430_v33 }
 0x40b   : > { %v1456_v45 = vrot.slane %v1448_v38, %v3781_v37  ;;  %v1463_v46 = vrot.slane %v1449_v39, %v3781_v37 }
 0x40c   : > { %v1427_v40 = vpop.permute.xlu0 %1426 }
 0x40d   : > { %v1432_v41 = vcombine.low %v1417_v16, %v1427_v40  ;;  %v1433_v43 = vcombine.high %v1417_v16, %v1427_v40 }
 0x40f   : > { %v1440_v48 = vrot.slane %v1432_v41, %v3781_v37  ;;  %v1447_v21 = vrot.slane %v1433_v43, %v3781_v37 }
 0x411   : > { %v1464_v49 = vcombine.low %v1440_v48, %v1456_v45  ;;  %v1465_v22 = vcombine.high %v1440_v48, %v1456_v45  ;;  %v1480_v50 = vcombine.low %v1447_v21, %v1463_v46  ;;  %v1481_v51 = vcombine.high %v1447_v21, %v1463_v46 }
 0x413   : > { %v1472_v52 = vrot.slane %v1464_v49, %v3783_v44  ;;  %v1479_v53 = vrot.slane %v1465_v22, %v3783_v44  ;;  %v1488_v54 = vrot.slane %v1480_v50, %v3783_v44  ;;  %v1495_v55 = vrot.slane %v1481_v51, %v3783_v44  ;;  %v1806_v50 = vld [vmem:[#allocation3] sm:$0xff]  ;;  %v1807_v51 = vld [vmem:[#allocation3 + $0x8] sm:$0xff] }
 0x415   : > { %v1500_v56 = vcombine.low %v1472_v52, %v1479_v53  ;;  %v2456_v57 = vcombine.high %v1472_v52, %v1479_v53  ;;  %v1516_v58 = vcombine.low %v1488_v54, %v1495_v55  ;;  %v2457_v59 = vcombine.high %v1488_v54, %v1495_v55 }
 0x417   : > { %v1507_v60 = vrot.slane %v1500_v56, %v3781_v37  ;;  %v1515_v61 = vrot.slane %v2456_v57, %v3781_v37  ;;  %v1523_v62 = vrot.slane %v1516_v58, %v3781_v37  ;;  %v1531_v47 = vrot.slane %v2457_v59, %v3781_v37 }
 0x419   : > { %v1532_v63 = vcombine.low %v1507_v60, %v1515_v61  ;;  %v1548_v0 = vcombine.low %v1523_v62, %v1531_v47  ;;  %v1533_v1 = vcombine.high %v1507_v60, %v1515_v61  ;;  %v1549_v2 = vcombine.high %v1523_v62, %v1531_v47 }
 0x41b   : > { %v1540_v3 = vrot.slane %v1532_v63, %v3783_v44  ;;  %v1556_v4 = vrot.slane %v1548_v0, %v3783_v44  ;;  %v1547_v12 = vrot.slane %v1533_v1, %v3783_v44  ;;  %v1563_v13 = vrot.slane %v1549_v2, %v3783_v44 }
 0x41d   : > { %v1564_v6 = vcombine.low %v1540_v3, %v1556_v4  ;;  %v1565_v7 = vcombine.high %v1540_v3, %v1556_v4  ;;  %v1566_v14 = vcombine.low %v1547_v12, %v1563_v13  ;;  %v1567_v15 = vcombine.high %v1547_v12, %v1563_v13  ;;  %v1808_v3 = vld [vmem:[#allocation3 + $0x10] sm:$0xff]  ;;  %v2762_v12 = vld [vmem:[%s4045_s19] sm:$0xff]  }
 0x41f   : > { %v1568_v10 = vpack.c.bf16 %v1564_v6, %v1564_v6  ;;  %v1569_v11 = vpack.c.bf16 %v1565_v7, %v1565_v7  ;;  %v1570_v16 = vpack.c.bf16 %v1566_v14, %v1566_v14  ;;  %v1571_v17 = vpack.c.bf16 %v1567_v15, %v1567_v15 }
 0x421   : > { %2534 = vmatmul.mubr.msk.bf16.vlgmr.msra.gmra.mrb[0].mxu1 %vm1580_vm5, %v1568_v10  ;;  %2540 = vmatmul.mubr.msk.bf16.vlgmr.msra.gmra.mrb[4].mxu0 %vm1580_vm5, %v1569_v11 }
 0x422   : > { %2544 = vmatpush3.bf16.xpose.msra.mxu1 %v1677_v8  ;;  %2550 = vmatpush3.bf16.xpose.msra.mxu0 %v1723_v9 }
 0x423   : > { %2545 = vmatprep.mubr.msk.bf16.mxu1 %vm3143_vm3, %v3142_v42  ;;  %2551 = vmatprep.mubr.msk.bf16.mxu0 %vm3143_vm3, %v3142_v42 }
 0x424   : > { %2555 = vmatprep.subr.bf16.mxu1 %v3142_v42  ;;  %2561 = vmatprep.subr.bf16.mxu0 %v3142_v42 }
 0x429   : > { %2546 = vmatmul.mubr.msk.bf16.vlgmr.msra.gmra.mrb[4].mxu1 %vm1580_vm5, %v1570_v16  ;;  %2552 = vmatmul.mubr.msk.bf16.vlgmr.msra.gmra.mrb[8].mxu0 %vm1580_vm5, %v1571_v17 }
 0x42a   : > { %2557 = vmatprep.mubr.msk.bf16.mxu1 %vm3143_vm3, %v3142_v42  ;;  %2563 = vmatprep.mubr.msk.bf16.mxu0 %vm3143_vm3, %v3142_v42 }
 0x42b   : > { %2556 = vmatpush3.bf16.msra.mxu1 %v1806_v50  ;;  %2562 = vmatpush3.bf16.msra.mxu0 %v1807_v51 }
 0x42c   : > { %2567 = vmatprep.subr.bf16.mxu1 %v3142_v42  ;;  %2573 = vmatprep.subr.bf16.mxu0 %v3142_v42 }
 0x4f4   : > { %v1621_v23 = vpop.f32.mrb[0].mxu1  ;;  %v1667_v24 = vpop.f32.mrb[4].mxu0 }
 0x4f5   : > { %v1622_v25 = vadd.f32 %v1621_v23, %v1575_v20  ;;  %v1668_v28 = vadd.f32 %v1667_v24, %v1575_v20  ;;  %v2535_v29 = vpop.f32.mrb[1].mxu1  ;;  %v2541_v30 = vpop.f32.mrb[5].mxu0 }
 0x4f6   : > { %v1624_v31 = vpop.f32.mrb[2].mxu1  ;;  %v1670_v26 = vpop.f32.mrb[6].mxu0 }
 0x4f7   : > { %v2536_v27 = vpop.f32.mrb[3].mxu1  ;;  %v2542_v32 = vpop.f32.mrb[7].mxu0  ;;  %v1766_v33 = vsel %vm1765_vm7, %v1622_v25, -inf  ;;  %v1769_v34 = vsel %vm1765_vm7, %v1668_v28, -inf }
 0x4f8   : > { %1767 = vmax.xlane.f32.xlu1 %v1766_v33  ;;  %1770 = vmax.xlane.f32.xlu0 %v1769_v34 }
 0x4fc   : > { %v1713_v36 = vpop.f32.mrb[4].mxu1  ;;  %v1759_v38 = vpop.f32.mrb[8].mxu0 }
 0x4fd   : > { %v1714_v39 = vadd.f32 %v1713_v36, %v1575_v20  ;;  %v1760_v40 = vadd.f32 %v1759_v38, %v1575_v20  ;;  %v2547_v41 = vpop.f32.mrb[5].mxu1  ;;  %v2553_v43 = vpop.f32.mrb[9].mxu0 }
 0x4fe   : > { %v1716_v45 = vpop.f32.mrb[6].mxu1  ;;  %v1762_v46 = vpop.f32.mrb[10].mxu0 }
 0x4ff   : > { %v2548_v48 = vpop.f32.mrb[7].mxu1  ;;  %v2554_v21 = vpop.f32.mrb[11].mxu0  ;;  %v1772_v49 = vsel %vm1765_vm7, %v1714_v39, -inf  ;;  %v1775_v22 = vsel %vm1765_vm7, %v1760_v40, -inf }
 0x500   : > { %1773 = vmax.xlane.f32.xlu0 %v1772_v49  ;;  %1776 = vmax.xlane.f32.xlu1 %v1775_v22 }
 0x585   : > { %v1768_v52 = vpop.xlane.xlu1 %1767  ;;  %v1771_v53 = vpop.xlane.xlu0 %1770 }
 0x586   : > { %v1778_v54 = vsub.f32 %v1622_v25, %v1768_v52  ;;  %v1779_v55 = vsub.f32 %v1668_v28, %v1771_v53 }
 0x588   : > { %v1782_v56 = vmul.f32 1.442695, %v1778_v54  ;;  %v1784_v57 = vmul.f32 1.442695, %v1779_v55 }
 0x58a   : > { %2764 = vpow2.f32 %v1782_v56 }
 0x58b   : > { %2766 = vpow2.f32 %v1784_v57  ;;  %v2763_v57 = vld [vmem:[%s4045_s19 + $0x8] sm:$0xff]  }
 0x58d   : > { %v1774_v58 = vpop.xlane.xlu0 %1773  ;;  %v1777_v59 = vpop.xlane.xlu1 %1776 }
 0x58e   : > { %v1780_v60 = vsub.f32 %v1714_v39, %v1774_v58  ;;  %v1781_v61 = vsub.f32 %v1760_v40, %v1777_v59 }
 0x590   : > { %v1786_v62 = vmul.f32 1.442695, %v1780_v60  ;;  %v1788_v47 = vmul.f32 1.442695, %v1781_v61 }
 0x592   : > { %2768 = vpow2.f32 %v1786_v62 }
 0x593   : > { %2770 = vpow2.f32 %v1788_v47 }
 0x594   : > { %v2765_v63 = vpop.eup %2764 }
 0x595   : > { %v2767_v0 = vpop.eup %2766  ;;  %v1790_v1 = vsel %vm1765_vm7, %v2765_v63, 0.0  ;;  %v1802_v2 = vpack.c.bf16 %v2765_v63, %v2765_v63 }
 0x596   : > { %1791 = vadd.xlane.f32.xlu0 %v1790_v1  ;;  %v1793_v4 = vsel %vm1765_vm7, %v2767_v0, 0.0  ;;  %v1803_v5 = vpack.c.bf16 %v2767_v0, %v2767_v0 }
 0x597   : > { %1794 = vadd.xlane.f32.xlu1 %v1793_v4  ;;  %2558 = vmatmul.mubr.msk.bf16.vlgmr.msra.gmra.mrb[8].mxu1 %vm1765_vm7, %v1802_v2 }
 0x598   : > { %2564 = vmatmul.mubr.msk.bf16.vlgmr.msra.gmra.mrb[12].mxu0 %vm1765_vm7, %v1803_v5  ;;  %2568 = vmatpush3.bf16.msra.mxu1 %v1808_v3 }
 0x599   : > { %2574 = vmatpush3.bf16.msra.mxu0 %v1809_v35  ;;  %2569 = vmatprep.mubr.msk.bf16.mxu1 %vm3143_vm3, %v3142_v42 }
 0x59a   : > { %2575 = vmatprep.mubr.msk.bf16.mxu0 %vm3143_vm3, %v3142_v42  ;;  %2579 = vmatprep.subr.bf16.mxu1 %v3142_v42 }
 0x59c   : > { %v2769_v6 = vpop.eup %2768 }
 0x59d   : > { %v2771_v7 = vpop.eup %2770  ;;  %v1796_v8 = vsel %vm1765_vm7, %v2769_v6, 0.0  ;;  %v1804_v9 = vpack.c.bf16 %v2769_v6, %v2769_v6 }
 0x59e   : > { %1797 = vadd.xlane.f32.xlu0 %v1796_v8  ;;  %v1799_v10 = vsel %vm1765_vm7, %v2771_v7, 0.0  ;;  %v1805_v11 = vpack.c.bf16 %v2771_v7, %v2771_v7 }
 0x59f   : > { %1800 = vadd.xlane.f32.xlu1 %v1799_v10  ;;  %2570 = vmatmul.mubr.msk.bf16.vlgmr.msra.gmra.mrb[12].mxu1 %vm1765_vm7, %v1804_v9 }
 0x5a0   : > { %2576 = vmatmul.mubr.msk.bf16.vlgmr.msra.gmra.mrb[16].mxu0 %vm1765_vm7, %v1805_v11  ;;  %2583 = vmatprep.mubr.msk.bf16.mxu1 %vm3143_vm3, %v3142_v42 }
 0x5a1   : > { %2580 = vmatpush3.bf16.msra.mxu1 %v2762_v12 }
 0x5a2   : > { %2581 = vmatprep.subr.bf16.mxu1 %v3142_v42 }
 0x5a5   : > { %2582 = vmatpush3.bf16.msra.mxu1 %v2763_v57 }
 0x623   : > { %v1792_v13 = vpop.xlane.xlu0 %1791 }
 0x624   : > { %v1795_v14 = vpop.xlane.xlu1 %1794  ;;  %2772 = vrcp.f32 %v1792_v13 }
 0x625   : > { %2774 = vrcp.f32 %v1795_v14 }
 0x62b   : > { %v1798_v15 = vpop.xlane.xlu0 %1797 }
 0x62c   : > { %v1801_v16 = vpop.xlane.xlu1 %1800  ;;  %2776 = vrcp.f32 %v1798_v15 }
 0x62d   : > { %2778 = vrcp.f32 %v1801_v16 }
 0x62e   : > { %v2773_v29 = vpop.eup %2772 }
 0x62f   : > { %v2775_v30 = vpop.eup %2774 }
 0x636   : > { %v2777_v31 = vpop.eup %2776 }
 0x637   : > { %v2779_v26 = vpop.eup %2778 }
 0x66a   : > { %v1847_v17 = vpop.f32.mrb[8].mxu1 }
 0x66b   : > { %v1890_v18 = vpop.f32.mrb[12].mxu0  ;;  %v2559_v19 = vpop.f32.mrb[9].mxu1  ;;  %v1986_v27 = vmul.f32 %v2773_v29, %v1847_v17 }
 0x66c   : > { %v2565_v20 = vpop.f32.mrb[13].mxu0  ;;  %v1850_v23 = vpop.f32.mrb[10].mxu1  ;;  %v1987_v36 = vmul.f32 %v2775_v30, %v1890_v18 }
 0x66d   : > { %v1893_v24 = vpop.f32.mrb[14].mxu0  ;;  %v2560_v25 = vpop.f32.mrb[11].mxu1  ;;  %v2468_v23 = vld [vmem:[%s4048_s8] ss:$0 sm:$0xff] }
 0x66e   : > { %v2566_v28 = vpop.f32.mrb[15].mxu0 }
 0x672   : > { %v1933_v42 = vpop.f32.mrb[12].mxu1 }
 0x673   : > { %v1988_v32 = vmul.f32 %v2777_v31, %v1933_v42  ;;  %v1976_v33 = vpop.f32.mrb[16].mxu0  ;;  %v2571_v34 = vpop.f32.mrb[13].mxu1 }
 0x674   : > { %v1989_v38 = vmul.f32 %v2779_v26, %v1976_v33  ;;  %v2577_v39 = vpop.f32.mrb[17].mxu0  ;;  %v1936_v40 = vpop.f32.mrb[14].mxu1 }
 0x675   : > { %v1990_v41 = vcombine.low %v1986_v27, %v1988_v32  ;;  %v1991_v43 = vcombine.high %v1986_v27, %v1988_v32  ;;  %v1979_v45 = vpop.f32.mrb[18].mxu0  ;;  %v2572_v46 = vpop.f32.mrb[15].mxu1 }
 0x676   : > { %v2006_v48 = vcombine.low %v1987_v36, %v1989_v38  ;;  %v2007_v21 = vcombine.high %v1987_v36, %v1989_v38  ;;  %v2578_v49 = vpop.f32.mrb[19].mxu0 }
 0x677   : > { %v1998_v22 = vrot.slane %v1990_v41, %v3781_v37  ;;  %v2005_v50 = vrot.slane %v1991_v43, %v3781_v37 }
 0x678   : > { %v2014_v51 = vrot.slane %v2006_v48, %v3781_v37  ;;  %v2021_v52 = vrot.slane %v2007_v21, %v3781_v37 }
 0x67a   : > { %v2022_v53 = vcombine.low %v1998_v22, %v2014_v51  ;;  %v2023_v54 = vcombine.high %v1998_v22, %v2014_v51  ;;  %v2038_v55 = vcombine.low %v2005_v50, %v2021_v52  ;;  %v2039_v56 = vcombine.high %v2005_v50, %v2021_v52 }
 0x67c   : > { %v2030_v58 = vrot.slane %v2022_v53, %v3783_v44  ;;  %v2037_v59 = vrot.slane %v2023_v54, %v3783_v44  ;;  %v2046_v60 = vrot.slane %v2038_v55, %v3783_v44  ;;  %v2053_v61 = vrot.slane %v2039_v56, %v3783_v44 }
 0x67e   : > { %v2058_v62 = vcombine.low %v2030_v58, %v2037_v59  ;;  %v2466_v47 = vcombine.high %v2030_v58, %v2037_v59  ;;  %v2074_v63 = vcombine.low %v2046_v60, %v2053_v61  ;;  %v2467_v0 = vcombine.high %v2046_v60, %v2053_v61 }
 0x680   : > { %v2065_v1 = vrot.slane %v2058_v62, %v3781_v37  ;;  %v2073_v2 = vrot.slane %v2466_v47, %v3781_v37  ;;  %v2081_v3 = vrot.slane %v2074_v63, %v3781_v37  ;;  %v2089_v4 = vrot.slane %v2467_v0, %v3781_v37 }
 0x682   : > { %v2091_v5 = vcombine.high %v2065_v1, %v2073_v2  ;;  %v2107_v35 = vcombine.high %v2081_v3, %v2089_v4  ;;  %v2090_v6 = vcombine.low %v2065_v1, %v2073_v2  ;;  %v2106_v7 = vcombine.low %v2081_v3, %v2089_v4 }
 0x684   : > { %v2105_v8 = vrot.slane %v2091_v5, %v3783_v44  ;;  %v2121_v9 = vrot.slane %v2107_v35, %v3783_v44  ;;  %v2098_v10 = vrot.slane %v2090_v6, %v3783_v44  ;;  %v2114_v11 = vrot.slane %v2106_v7, %v3783_v44 }
 0x686   : > { %v2124_v12 = vcombine.low %v2105_v8, %v2121_v9  ;;  %v2123_v13 = vcombine.high %v2098_v10, %v2114_v11  ;;  %v2125_v14 = vcombine.high %v2105_v8, %v2121_v9  ;;  %v2122_v15 = vcombine.low %v2098_v10, %v2114_v11 }
 0x688   : > { %2131 = vrot.lane.b32.xlu1 %v2124_v12, %s3149_s20  ;;  %2127 = vrot.lane.b32.xlu0 %v2123_v13, %s3150_s10  ;;  %s4049_s20 = sld [smem:[#allocation44_spill]] }
 0x68c   : > { %2135 = vrot.lane.b32.xlu1 %v2125_v14, %s3151_s2  ;;  %s3152_s2 = smov [#allocation16]  }
 0x68d   : > { %s2988_s12 = sshll.u32 %s3152_s2, 4  ;;  %s2989_s12 = int_to_ptr.vmem [resolvable:$false] %s2988_s12 }
 0x68e   : > { %s3875_s10 = scalar_lea.hbm %s4049_s20, %s2474_s9  ;;  %s2990_s16 = scalar_lea.vmem %s2989_s12, 256 }
 0x68f   : > { %p2991_p0 = scmp.lt.s32.totalorder %s3877_s18, %s2989_s12  ;;  %p2992_p5 = scmp.lt.s32.totalorder %s2990_s16, %s2984_s14 }
 0x691   : > { %p2993_p4 = por %p2992_p5, %p2991_p0 }
 0x693   : > { %p2994_p13 = pnand %p2993_p4, %p2987_p10 }
 0x6fa   : > { %v2132_v37 = vpop.permute.xlu1 %2131  ;;  %v2128_v16 = vpop.permute.xlu0 %2127 }
 0x6fb   : > { %v2138_v17 = vsel %vm1580_vm5, %v2122_v15, %v2128_v16 }
 0x6fc   : > { %v2139_v44 = vsel %vm1765_vm7, %v2138_v17, %v2132_v37 }
 0x6fe   : > { %v2136_v18 = vpop.permute.xlu1 %2135 }
 0x6ff   : > { %v2141_v19 = vsel %vm2140_vm8, %v2139_v44, %v2136_v18 }
 0x700   : > { %v2142_v20 = vpack.c.bf16 %v2141_v19, %v2141_v19 }
 0x702   : > { %2584 = vmatmul.mubr.msk.bf16.vlgmr.msra.gmra.mrb[16].mxu1 %vm1378_vm4, %v2142_v20 }
 0x7d5   : > { %v2203_v24 = vpop.f32.mrb[16].mxu1 }
 0x7d6   : > { %v2204_v25 = vadd.f32 %v2468_v23, %v2203_v24  ;;  %v2585_v28 = vpop.f32.mrb[17].mxu1 }
 0x7d7   : > { %v2206_v29 = vpop.f32.mrb[18].mxu1 }
 0x7d8   : > { %2209 = vst.msk [vmem:[%s3625_s11] sm:$0xff] %vm1378_vm4, %v2204_v25  ;;  %v2586_v30 = vpop.f32.mrb[19].mxu1 }
 0x7d9   : > { %2997 = shalt.err (!%p2994_p13)
}
 0x7da   : > { %s2998_s28 = scalar_lea.hbm %s3875_s10, 128  ;;  %s3002_s5 = scalar_lea.hbm %s4049_s20, 512 }
 0x7db   : > { %p2999_p8 = scmp.ne.s32.totalorder %s3875_s10, %s2998_s28  ;;  %p3003_p9 = scmp.lt.u32.totalorder %s3875_s10, %s4049_s20 }
 0x7dc   : > { %p3004_p1 = scmp.lt.u32.totalorder %s3002_s5, %s2998_s28  ;;  %p3006_p6 = scmp.lt.u32.totalorder %s2998_s28, %s3875_s10 }
 0x7dd   : > { %p3000_p3 = pnand %p2999_p8, %p4050_p12 }
 0x7de   : > { %p3005_p2 = por %p3004_p1, %p3003_p9 }
 0x7df   : > { %p3001_p7 = pneg %p3000_p3 }
 0x7e0   : > { %p3007_p11 = por %p3006_p6, %p3005_p2 }
 0x7e2   : > { %p3008_p10 = pnand %p3007_p11, %p3001_p7 }
 0x7e4   : > { %3011 = shalt.err (!%p3008_p10)
}
 0x7e5   : > { %2607 = dma.vmem_to_hbm [thread:$0]  (%p4050_p12), %s3877_s18, 128, %s3875_s10, %s2211_s3  }
 0x7e6 PF: > { %p2643_p0 = scmp.ge.s32.totalorder %s3122_s13, 2  ;;  %s2238_s1 = sand.u32 1, %s3094_s24  }
 0x7e7   : > { %p4051_p5 = scmp.ne.s32.totalorder %s4018_s27, 0  ;;  %s2239_s21 = scalar_lea.sflag [#allocation6], %s2238_s1 }
 0x7e9   : > { %p2633_p4 = pnand %p2643_p0, %p4051_p5 }
 0x7eb   : > { %3077 = dma.done.wait (!%p2633_p4), %s2239_s21, 128  }
 0x7ec   : > { %3079 = vsyncadd (!%p2633_p4), %s2239_s21, 4294967168  ;;  %s35_s13 = sadd.s32 1, %s3122_s13   ;;  %s4052_s21 = sld [smem:[#allocation23_spill]] }
 0x7ed   : > { %p32_p13 = scmp.ge.s32.totalorder %s35_s13, 6   ;;  %s4053_s15 = smov %s3481_s22 }
 0x7ee   : > { %s4054_s18 = sld [smem:[#allocation30_spill]]  ;;  %s4055_s10 = sld [smem:[#allocation31_spill]] }
 0x7ef   : > { %s4056_s22 = smov %s3090_s23  ;;  %s4057_s23 = smov %s3478_s4 }
 0x7f0   : > { %s4058_s24 = smov %s3098_s25  ;;  %s4059_s25 = smov %s3102_s26 }
 0x7f1   : > { %s4060_s26 = smov %s4053_s15  ;;  %s4061_s27 = smov %s3114_s29 }
 0x7f2   : > { %s4062_s28 = smov %s3118_s30  ;;  %34 = sbr.rel (!%p32_p13) target bundleno = 28 (0x1c), region = 166 }
 0x7f4   : > { %s4063_s29 = smov %s4054_s18  ;;  %s4064_s30 = smov %s4055_s10 }
 0x7f9   :  { %2244 = vsyncpa [#allocation5], 1 }
 0x7fa   :  { %2246 = vsyncpa [#allocation5 + $0x1], 1 }
 0x7fb   :  { %2247 = vsyncpa [#allocation8], 1 }
 0x7fc   :  { %2249 = vsyncpa [#allocation8 + $0x1], 1 }
 0x7fd   :  { %2250 = vsyncpa [#allocation11], 1 }
 0x7fe   :  { %2252 = vsyncpa [#allocation11 + $0x1], 1 }
 0x7ff   :  { %2253 = vsyncpa [#allocation14], 1 }
 0x800   :  { %2254 = vsyncpa [#allocation6], 1 }
 0x801   :  { %2256 = vsyncpa [#allocation6 + $0x1], 1 }

</bundles_post_ra>
